<compile_context>
chip_gen: v5e
topology: v5e:2x2
jax: 0.10.0
libtpu: 0.0.40
codegen_flags: <defaults>
</compile_context>

<pallas_src>
import math

import jax
import jax.numpy as jnp
import numpy as np
from jax import lax
from jax.experimental import pallas as pl
from jax.experimental.pallas import tpu as pltpu


def net_forward(x, params):
    """x: (N, H, W, 3) float32 NHWC.  Returns (N, H2, W2, 2) float32 NHWC."""
    w1, b1, w2, b2, w3, b3 = params
    N, H, W, Cin = x.shape
    C1 = w1.shape[-1]                       # 16
    C2 = w2.shape[-1]                       # 16
    C3 = w3.shape[-1]                       # 2
    K1 = w1.shape[0]                        # 3
    K2 = w2.shape[0]                        # 4
    H1, W1 = H - K1 + 1, W - K1 + 1         # conv1 (valid): 14 x 14
    Hp, Wp = (H1 - 3) // 2 + 1, (W1 - 3) // 2 + 1   # maxpool 3x3 s2 (floor): 6 x 6
    H2, W2 = Hp - K2 + 1, Wp - K2 + 1       # conv2 (valid): 3 x 3 (conv3 is 1x1)

    HF = H + 1                              # +1 zero row -> all flat tap slices in bounds
    HB = 8                                  # rows per w-block in the w-major pooled scratch
    MQ = (Wp + 1) * HB                      # pooled scratch rows (56)
    M2 = W2 * HB                            # conv2/conv3 LHS rows (24 = 3 valid cols x 8)
    KC1 = K1 * K1 * Cin                     # 27  (conv1 im2col contraction)
    KC2 = K2 * K2 * C1                      # 256 (conv2 im2col contraction)
    CO = 128                                # conv3 output channels padded 2 -> 128

    bf16 = jnp.bfloat16

    # ---- wrapper-side layout plumbing (one-time XLA ops) --------------------
    # conv1 im2col: lane index = (kh*K1 + kw)*Cin + c.  Columns with ow >= W1 are
    # garbage and are never read by the valid pooling windows downstream.
    xp = jnp.pad(x, ((0, 0), (0, 1), (0, 0), (0, 0)))            # one zero pad row
    x_flat = xp.reshape(N, HF * W, Cin)
    taps = [x_flat[:, kh * W + kw: kh * W + kw + H1 * W, :]
            for kh in range(K1) for kw in range(K1)]
    x_cols = jnp.concatenate(taps, axis=-1).astype(bf16)         # (N, 224, 27)

    w1_cat = w1.reshape(KC1, C1).astype(bf16)                    # (27, 16)
    w2_cat = w2.reshape(KC2, C2).astype(bf16)                    # (256, 16)
    w3_pad = jnp.pad(w3, ((0, 0), (0, CO - C3))).astype(bf16)    # (16, 128)
    b1r = b1.reshape(1, C1).astype(jnp.float32)
    b2r = b2.reshape(1, C2).astype(jnp.float32)
    b3r = jnp.pad(b3, (0, CO - C3)).reshape(1, CO).astype(jnp.float32)

    steps = min(2, N)                 # <= 2 grid steps: one per v7x TensorCore
    B = pl.cdiv(N, steps)             # images per grid step (static in-kernel loop)
    Np = steps * B
    if Np != N:
        x_cols = jnp.pad(x_cols, ((0, Np - N), (0, 0), (0, 0)))

    def kernel(x_ref, w1_ref, b1_ref, w2_ref, b2_ref, w3_ref, b3_ref,
               out_ref, hm_ref, q_ref, lhs2_ref):
        f32 = jnp.float32

        # Zero the pooled scratch once per grid step (~2 KiB).  Only the pad
        # strips (rows h >= Hp of each w-block and the w == Wp block) are read
        # without being rewritten, and those only feed discarded output rows,
        # but zeroing keeps everything deterministic.
        q_ref[...] = jnp.zeros((MQ, C1), bf16)

        for b in range(B):
            # ---- conv1: single MXU dot on the wrapper-built im2col block ----
            acc1 = jnp.dot(x_ref[b], w1_ref[...],
                           preferred_element_type=f32) + b1_ref[...]   # (224, 16)
            c1 = acc1.reshape(H1, W, C1)                               # (14, 16, 16)

            # ---- maxpool 3x3 stride 2 (floor) + ReLU ------------------------
            # Height: stride-2 row selection via leading-dim-only reshapes.
            t0 = c1[0:2 * Hp].reshape(Hp, 2, W, C1)        # rows 2h / 2h+1
            t2 = c1[2:2 * Hp + 2].reshape(Hp, 2, W, C1)    # rows 2h+2
            hm_ref[...] = jnp.maximum(jnp.maximum(t0[:, 0], t0[:, 1]), t2[:, 0])

            # Width + ReLU: per pooled column, max of 3 hm columns, stored
            # w-major into the flat pooled scratch (contiguous stores only).
            for w in range(Wp):
                col = jnp.maximum(
                    jnp.maximum(hm_ref[:, 2 * w, :], hm_ref[:, 2 * w + 1, :]),
                    jnp.maximum(hm_ref[:, 2 * w + 2, :], 0.0))          # (6, 16)
                q_ref[pl.ds(w * HB, Hp), :] = col.astype(bf16)

            # ---- conv2: 16 contiguous tap slices -> (24, 256) LHS, one dot --
            # q_flat[(kw+ow)*HB + (kh+oh), c] = pooled[oh+kh, ow+kw, c] for all
            # valid outputs; rows with oh >= H2 are garbage and discarded.
            for kh in range(K2):
                for kw in range(K2):
                    t = kh * K2 + kw
                    lhs2_ref[:, pl.ds(t * C1, C1)] = q_ref[pl.ds(kw * HB + kh, M2), :]
            acc2 = jnp.dot(lhs2_ref[...], w2_ref[...],
                           preferred_element_type=f32) + b2_ref[...]    # (24, 16)
            acc2 = jnp.maximum(acc2, 0.0)                               # ReLU

            # ---- conv3 (1x1), channels padded to 128 -> dense slab store ----
            out = jnp.dot(acc2.astype(bf16), w3_ref[...],
                          preferred_element_type=f32) + b3_ref[...]     # (24, 128)
            out_ref[b] = out.astype(out_ref.dtype)

    out_flat = pl.pallas_call(
        kernel,
        out_shape=jax.ShapeDtypeStruct((Np, M2, CO), jnp.float32),
        grid=(steps,),
        in_specs=[
            pl.BlockSpec((B, H1 * W, KC1), lambda i: (i, 0, 0)),
            pl.BlockSpec((KC1, C1), lambda i: (0, 0)),
            pl.BlockSpec((1, C1), lambda i: (0, 0)),
            pl.BlockSpec((KC2, C2), lambda i: (0, 0)),
            pl.BlockSpec((1, C2), lambda i: (0, 0)),
            pl.BlockSpec((C2, CO), lambda i: (0, 0)),
            pl.BlockSpec((1, CO), lambda i: (0, 0)),
        ],
        out_specs=pl.BlockSpec((B, M2, CO), lambda i: (i, 0, 0)),
        scratch_shapes=[
            pltpu.VMEM((Hp, W, C1), jnp.float32),   # height-pooled rows
            pltpu.VMEM((MQ, C1), bf16),             # w-major flat pooled map
            pltpu.VMEM((M2, KC2), bf16),            # conv2 im2col LHS
        ],
        compiler_params=pltpu.CompilerParams(
            dimension_semantics=("parallel",)),     # batch axis -> 2 TCs on v7x
    )(x_cols, w1_cat, b1r, w2_cat, b2r, w3_pad, b3r)

    # Lane-dense slab -> valid (N, H2, W2, C3) window (pure XLA slicing).
    # LHS rows were j = ow*HB + oh, so axis order after reshape is (n, ow, oh, c).
    y = out_flat[:N, :, :C3].reshape(N, W2, HB, C3)[:, :, :H2, :]
    return jnp.transpose(y, (0, 2, 1, 3))


def net_reference(x, params):
    """Pure-JAX reference (same NHWC/HWIO layout) for the correctness check."""
    w1, b1, w2, b2, w3, b3 = params
    dn = ("NHWC", "HWIO", "NHWC")
    y = lax.conv_general_dilated(x, w1, (1, 1), "VALID", dimension_numbers=dn) + b1
    y = lax.reduce_window(y, -jnp.inf, lax.max, (1, 3, 3, 1), (1, 2, 2, 1), "VALID")
    y = jnp.maximum(y, 0.0)
    y = lax.conv_general_dilated(y, w2, (1, 1), "VALID", dimension_numbers=dn) + b2
    y = jnp.maximum(y, 0.0)
    y = jnp.einsum("nhwc,cd->nhwd", y, w3) + b3
    return y


def _init_conv(key, kh, kw, cin, cout):
    """Deterministic PyTorch-style (kaiming-uniform-ish) init, HWIO layout."""
    kw_key, kb_key = jax.random.split(key)
    bound = 1.0 / math.sqrt(kh * kw * cin)
    w = jax.random.uniform(kw_key, (kh, kw, cin, cout), jnp.float32, -bound, bound)
    b = jax.random.uniform(kb_key, (cout,), jnp.float32, -bound, bound)
    return w, b


if __name__ == "__main__":
    key = jax.random.PRNGKey(0)
    ks = jax.random.split(key, 4)

    # Small input consistent with the module: NCHW (2, 3, 16, 16) -> NHWC here.
    N, H, W = 2, 16, 16
    x = jax.random.normal(ks[0], (N, H, W, 3), jnp.float32)

    w1, b1 = _init_conv(ks[1], 3, 3, 3, 16)     # nn.Conv2d(3, 16, 3)
    w2, b2 = _init_conv(ks[2], 4, 4, 16, 16)    # nn.Conv2d(16, 16, 4)
    w3_4d, b3 = _init_conv(ks[3], 1, 1, 16, 2)  # nn.Conv2d(16, 2, 1)
    w3 = w3_4d.reshape(16, 2)
    params = (w1, b1, w2, b2, w3, b3)

    out = jax.block_until_ready(net_forward(x, params))
    ref = jax.block_until_ready(net_reference(x, params))
    assert out.shape == (N, 3, 3, 2), out.shape
    np.testing.assert_allclose(np.asarray(out), np.asarray(ref), rtol=2e-2, atol=2e-2)

    print("KERNEL_OK")
</pallas_src>

<mosaic_0001>
module attributes {stable_mosaic.version = 11 : i64} {
  func.func @kernel(%arg0: i32, %arg1: memref<1x224x27xbf16, #tpu.memory_space<vmem>>, %arg2: memref<27x16xbf16, #tpu.memory_space<vmem>>, %arg3: memref<1x16xf32, #tpu.memory_space<vmem>>, %arg4: memref<256x16xbf16, #tpu.memory_space<vmem>>, %arg5: memref<1x16xf32, #tpu.memory_space<vmem>>, %arg6: memref<16x128xbf16, #tpu.memory_space<vmem>>, %arg7: memref<1x128xf32, #tpu.memory_space<vmem>>, %arg8: memref<1x24x128xf32, #tpu.memory_space<vmem>>, %arg9: memref<6x16x16xf32, #tpu.memory_space<vmem>>, %arg10: memref<56x16xbf16, #tpu.memory_space<vmem>>, %arg11: memref<24x256xbf16, #tpu.memory_space<vmem>>) attributes {dimension_semantics = [#tpu.dimension_semantics<parallel>], iteration_bounds = array<i64: 2>, scalar_prefetch = 0 : i64, scratch_operands = 3 : i64, tpu.core_type = #tpu.core_type<tc>, window_params = [{transform_indices = @transform_0, window_bounds = array<i64: 1, 224, 27>}, {pipeline_mode = #tpu.pipeline_mode<synchronous>, transform_indices = @transform_1, window_bounds = array<i64: 27, 16>}, {pipeline_mode = #tpu.pipeline_mode<synchronous>, transform_indices = @transform_2, window_bounds = array<i64: 1, 16>}, {pipeline_mode = #tpu.pipeline_mode<synchronous>, transform_indices = @transform_3, window_bounds = array<i64: 256, 16>}, {pipeline_mode = #tpu.pipeline_mode<synchronous>, transform_indices = @transform_4, window_bounds = array<i64: 1, 16>}, {pipeline_mode = #tpu.pipeline_mode<synchronous>, transform_indices = @transform_5, window_bounds = array<i64: 16, 128>}, {pipeline_mode = #tpu.pipeline_mode<synchronous>, transform_indices = @transform_6, window_bounds = array<i64: 1, 128>}, {transform_indices = @transform_7, window_bounds = array<i64: 1, 24, 128>}]} {
    %cst = arith.constant 0.000000e+00 : bf16
    %0 = vector.broadcast %cst : bf16 to vector<56x16xbf16>
    %c0 = arith.constant 0 : index
    %c0_0 = arith.constant 0 : index
    %1 = vector.load %arg10[%c0, %c0_0] : memref<56x16xbf16, #tpu.memory_space<vmem>>, vector<56x16xbf16>
    tpu.vector_store %arg10[%c0, %c0_0], %0 {strides = array<i32>} : memref<56x16xbf16, #tpu.memory_space<vmem>>, vector<56x16xbf16>,
    %c0_1 = arith.constant 0 : index
    %c0_2 = arith.constant 0 : index
    %c0_3 = arith.constant 0 : index
    %2 = vector.load %arg1[%c0_1, %c0_2, %c0_3] : memref<1x224x27xbf16, #tpu.memory_space<vmem>>, vector<1x224x27xbf16>
    %3 = vector.shape_cast %2 : vector<1x224x27xbf16> to vector<224x27xbf16>
    %c0_4 = arith.constant 0 : index
    %c0_5 = arith.constant 0 : index
    %4 = vector.load %arg2[%c0_4, %c0_5] : memref<27x16xbf16, #tpu.memory_space<vmem>>, vector<27x16xbf16>
    %cst_6 = arith.constant dense<0.000000e+00> : vector<224x16xf32>
    %5 = tpu.matmul %3, %4, %cst_6 {dimension_numbers = #tpu.dot_dimension_numbers<[1], [0], [0], [1], [0, 0, 1, 1], [], []>} : vector<224x27xbf16>, vector<27x16xbf16>, vector<224x16xf32> -> vector<224x16xf32>
    %c0_7 = arith.constant 0 : index
    %c0_8 = arith.constant 0 : index
    %6 = vector.load %arg3[%c0_7, %c0_8] : memref<1x16xf32, #tpu.memory_space<vmem>>, vector<1x16xf32>
    %7 = vector.broadcast %6 : vector<1x16xf32> to vector<224x16xf32>
    %8 = arith.addf %5, %7 : vector<224x16xf32>
    %9 = vector.shape_cast %8 : vector<224x16xf32> to vector<14x16x16xf32>
    %10 = vector.extract_strided_slice %9 {offsets = [0, 0, 0], sizes = [12, 16, 16], strides = [1, 1, 1]} : vector<14x16x16xf32> to vector<12x16x16xf32>
    %11 = vector.shape_cast %10 : vector<12x16x16xf32> to vector<6x2x16x16xf32>
    %12 = vector.extract_strided_slice %9 {offsets = [2, 0, 0], sizes = [12, 16, 16], strides = [1, 1, 1]} : vector<14x16x16xf32> to vector<12x16x16xf32>
    %13 = vector.shape_cast %12 : vector<12x16x16xf32> to vector<6x2x16x16xf32>
    %14 = vector.extract_strided_slice %11 {offsets = [0, 0, 0, 0], sizes = [6, 1, 16, 16], strides = [1, 1, 1, 1]} : vector<6x2x16x16xf32> to vector<6x1x16x16xf32>
    %15 = vector.shape_cast %14 : vector<6x1x16x16xf32> to vector<6x16x16xf32>
    %16 = vector.extract_strided_slice %11 {offsets = [0, 1, 0, 0], sizes = [6, 1, 16, 16], strides = [1, 1, 1, 1]} : vector<6x2x16x16xf32> to vector<6x1x16x16xf32>
    %17 = vector.shape_cast %16 : vector<6x1x16x16xf32> to vector<6x16x16xf32>
    %18 = arith.maximumf %15, %17 : vector<6x16x16xf32>
    %19 = vector.extract_strided_slice %13 {offsets = [0, 0, 0, 0], sizes = [6, 1, 16, 16], strides = [1, 1, 1, 1]} : vector<6x2x16x16xf32> to vector<6x1x16x16xf32>
    %20 = vector.shape_cast %19 : vector<6x1x16x16xf32> to vector<6x16x16xf32>
    %21 = arith.maximumf %18, %20 : vector<6x16x16xf32>
    %c0_9 = arith.constant 0 : index
    %c0_10 = arith.constant 0 : index
    %c0_11 = arith.constant 0 : index
    %22 = vector.load %arg9[%c0_9, %c0_10, %c0_11] : memref<6x16x16xf32, #tpu.memory_space<vmem>>, vector<6x16x16xf32>
    tpu.vector_store %arg9[%c0_9, %c0_10, %c0_11], %21 {strides = array<i32>} : memref<6x16x16xf32, #tpu.memory_space<vmem>>, vector<6x16x16xf32>,
    %c0_12 = arith.constant 0 : index
    %c0_13 = arith.constant 0 : index
    %c0_14 = arith.constant 0 : index
    %23 = vector.load %arg9[%c0_12, %c0_13, %c0_14] : memref<6x16x16xf32, #tpu.memory_space<vmem>>, vector<6x1x16xf32>
    %24 = vector.shape_cast %23 : vector<6x1x16xf32> to vector<6x16xf32>
    %c0_15 = arith.constant 0 : index
    %c1 = arith.constant 1 : index
    %c0_16 = arith.constant 0 : index
    %25 = vector.load %arg9[%c0_15, %c1, %c0_16] : memref<6x16x16xf32, #tpu.memory_space<vmem>>, vector<6x1x16xf32>
    %26 = vector.shape_cast %25 : vector<6x1x16xf32> to vector<6x16xf32>
    %27 = arith.maximumf %24, %26 : vector<6x16xf32>
    %c0_17 = arith.constant 0 : index
    %c2 = arith.constant 2 : index
    %c0_18 = arith.constant 0 : index
    %28 = vector.load %arg9[%c0_17, %c2, %c0_18] : memref<6x16x16xf32, #tpu.memory_space<vmem>>, vector<6x1x16xf32>
    %29 = vector.shape_cast %28 : vector<6x1x16xf32> to vector<6x16xf32>
    %cst_19 = arith.constant 0.000000e+00 : f32
    %30 = vector.broadcast %cst_19 : f32 to vector<6x16xf32>
    %31 = arith.maximumf %29, %30 : vector<6x16xf32>
    %32 = arith.maximumf %27, %31 : vector<6x16xf32>
    %33 = arith.truncf %32 : vector<6x16xf32> to vector<6x16xbf16>
    %c0_20 = arith.constant 0 : index
    %c0_21 = arith.constant 0 : index
    %34 = vector.load %arg10[%c0_20, %c0_21] : memref<56x16xbf16, #tpu.memory_space<vmem>>, vector<6x16xbf16>
    tpu.vector_store %arg10[%c0_20, %c0_21], %33 {strides = array<i32>} : memref<56x16xbf16, #tpu.memory_space<vmem>>, vector<6x16xbf16>,
    %c0_22 = arith.constant 0 : index
    %c2_23 = arith.constant 2 : index
    %c0_24 = arith.constant 0 : index
    %35 = vector.load %arg9[%c0_22, %c2_23, %c0_24] : memref<6x16x16xf32, #tpu.memory_space<vmem>>, vector<6x1x16xf32>
    %36 = vector.shape_cast %35 : vector<6x1x16xf32> to vector<6x16xf32>
    %c0_25 = arith.constant 0 : index
    %c3 = arith.constant 3 : index
    %c0_26 = arith.constant 0 : index
    %37 = vector.load %arg9[%c0_25, %c3, %c0_26] : memref<6x16x16xf32, #tpu.memory_space<vmem>>, vector<6x1x16xf32>
    %38 = vector.shape_cast %37 : vector<6x1x16xf32> to vector<6x16xf32>
    %39 = arith.maximumf %36, %38 : vector<6x16xf32>
    %c0_27 = arith.constant 0 : index
    %c4 = arith.constant 4 : index
    %c0_28 = arith.constant 0 : index
    %40 = vector.load %arg9[%c0_27, %c4, %c0_28] : memref<6x16x16xf32, #tpu.memory_space<vmem>>, vector<6x1x16xf32>
    %41 = vector.shape_cast %40 : vector<6x1x16xf32> to vector<6x16xf32>
    %cst_29 = arith.constant 0.000000e+00 : f32
    %42 = vector.broadcast %cst_29 : f32 to vector<6x16xf32>
    %43 = arith.maximumf %41, %42 : vector<6x16xf32>
    %44 = arith.maximumf %39, %43 : vector<6x16xf32>
    %45 = arith.truncf %44 : vector<6x16xf32> to vector<6x16xbf16>
    %c8 = arith.constant 8 : index
    %c0_30 = arith.constant 0 : index
    %46 = vector.load %arg10[%c8, %c0_30] : memref<56x16xbf16, #tpu.memory_space<vmem>>, vector<6x16xbf16>
    tpu.vector_store %arg10[%c8, %c0_30], %45 {strides = array<i32>} : memref<56x16xbf16, #tpu.memory_space<vmem>>, vector<6x16xbf16>,
    %c0_31 = arith.constant 0 : index
    %c4_32 = arith.constant 4 : index
    %c0_33 = arith.constant 0 : index
    %47 = vector.load %arg9[%c0_31, %c4_32, %c0_33] : memref<6x16x16xf32, #tpu.memory_space<vmem>>, vector<6x1x16xf32>
    %48 = vector.shape_cast %47 : vector<6x1x16xf32> to vector<6x16xf32>
    %c0_34 = arith.constant 0 : index
    %c5 = arith.constant 5 : index
    %c0_35 = arith.constant 0 : index
    %49 = vector.load %arg9[%c0_34, %c5, %c0_35] : memref<6x16x16xf32, #tpu.memory_space<vmem>>, vector<6x1x16xf32>
    %50 = vector.shape_cast %49 : vector<6x1x16xf32> to vector<6x16xf32>
    %51 = arith.maximumf %48, %50 : vector<6x16xf32>
    %c0_36 = arith.constant 0 : index
    %c6 = arith.constant 6 : index
    %c0_37 = arith.constant 0 : index
    %52 = vector.load %arg9[%c0_36, %c6, %c0_37] : memref<6x16x16xf32, #tpu.memory_space<vmem>>, vector<6x1x16xf32>
    %53 = vector.shape_cast %52 : vector<6x1x16xf32> to vector<6x16xf32>
    %cst_38 = arith.constant 0.000000e+00 : f32
    %54 = vector.broadcast %cst_38 : f32 to vector<6x16xf32>
    %55 = arith.maximumf %53, %54 : vector<6x16xf32>
    %56 = arith.maximumf %51, %55 : vector<6x16xf32>
    %57 = arith.truncf %56 : vector<6x16xf32> to vector<6x16xbf16>
    %c16 = arith.constant 16 : index
    %c0_39 = arith.constant 0 : index
    %58 = vector.load %arg10[%c16, %c0_39] : memref<56x16xbf16, #tpu.memory_space<vmem>>, vector<6x16xbf16>
    tpu.vector_store %arg10[%c16, %c0_39], %57 {strides = array<i32>} : memref<56x16xbf16, #tpu.memory_space<vmem>>, vector<6x16xbf16>,
    %c0_40 = arith.constant 0 : index
    %c6_41 = arith.constant 6 : index
    %c0_42 = arith.constant 0 : index
    %59 = vector.load %arg9[%c0_40, %c6_41, %c0_42] : memref<6x16x16xf32, #tpu.memory_space<vmem>>, vector<6x1x16xf32>
    %60 = vector.shape_cast %59 : vector<6x1x16xf32> to vector<6x16xf32>
    %c0_43 = arith.constant 0 : index
    %c7 = arith.constant 7 : index
    %c0_44 = arith.constant 0 : index
    %61 = vector.load %arg9[%c0_43, %c7, %c0_44] : memref<6x16x16xf32, #tpu.memory_space<vmem>>, vector<6x1x16xf32>
    %62 = vector.shape_cast %61 : vector<6x1x16xf32> to vector<6x16xf32>
    %63 = arith.maximumf %60, %62 : vector<6x16xf32>
    %c0_45 = arith.constant 0 : index
    %c8_46 = arith.constant 8 : index
    %c0_47 = arith.constant 0 : index
    %64 = vector.load %arg9[%c0_45, %c8_46, %c0_47] : memref<6x16x16xf32, #tpu.memory_space<vmem>>, vector<6x1x16xf32>
    %65 = vector.shape_cast %64 : vector<6x1x16xf32> to vector<6x16xf32>
    %cst_48 = arith.constant 0.000000e+00 : f32
    %66 = vector.broadcast %cst_48 : f32 to vector<6x16xf32>
    %67 = arith.maximumf %65, %66 : vector<6x16xf32>
    %68 = arith.maximumf %63, %67 : vector<6x16xf32>
    %69 = arith.truncf %68 : vector<6x16xf32> to vector<6x16xbf16>
    %c24 = arith.constant 24 : index
    %c0_49 = arith.constant 0 : index
    %70 = vector.load %arg10[%c24, %c0_49] : memref<56x16xbf16, #tpu.memory_space<vmem>>, vector<6x16xbf16>
    tpu.vector_store %arg10[%c24, %c0_49], %69 {strides = array<i32>} : memref<56x16xbf16, #tpu.memory_space<vmem>>, vector<6x16xbf16>,
    %c0_50 = arith.constant 0 : index
    %c8_51 = arith.constant 8 : index
    %c0_52 = arith.constant 0 : index
    %71 = vector.load %arg9[%c0_50, %c8_51, %c0_52] : memref<6x16x16xf32, #tpu.memory_space<vmem>>, vector<6x1x16xf32>
    %72 = vector.shape_cast %71 : vector<6x1x16xf32> to vector<6x16xf32>
    %c0_53 = arith.constant 0 : index
    %c9 = arith.constant 9 : index
    %c0_54 = arith.constant 0 : index
    %73 = vector.load %arg9[%c0_53, %c9, %c0_54] : memref<6x16x16xf32, #tpu.memory_space<vmem>>, vector<6x1x16xf32>
    %74 = vector.shape_cast %73 : vector<6x1x16xf32> to vector<6x16xf32>
    %75 = arith.maximumf %72, %74 : vector<6x16xf32>
    %c0_55 = arith.constant 0 : index
    %c10 = arith.constant 10 : index
    %c0_56 = arith.constant 0 : index
    %76 = vector.load %arg9[%c0_55, %c10, %c0_56] : memref<6x16x16xf32, #tpu.memory_space<vmem>>, vector<6x1x16xf32>
    %77 = vector.shape_cast %76 : vector<6x1x16xf32> to vector<6x16xf32>
    %cst_57 = arith.constant 0.000000e+00 : f32
    %78 = vector.broadcast %cst_57 : f32 to vector<6x16xf32>
    %79 = arith.maximumf %77, %78 : vector<6x16xf32>
    %80 = arith.maximumf %75, %79 : vector<6x16xf32>
    %81 = arith.truncf %80 : vector<6x16xf32> to vector<6x16xbf16>
    %c32 = arith.constant 32 : index
    %c0_58 = arith.constant 0 : index
    %82 = vector.load %arg10[%c32, %c0_58] : memref<56x16xbf16, #tpu.memory_space<vmem>>, vector<6x16xbf16>
    tpu.vector_store %arg10[%c32, %c0_58], %81 {strides = array<i32>} : memref<56x16xbf16, #tpu.memory_space<vmem>>, vector<6x16xbf16>,
    %c0_59 = arith.constant 0 : index
    %c10_60 = arith.constant 10 : index
    %c0_61 = arith.constant 0 : index
    %83 = vector.load %arg9[%c0_59, %c10_60, %c0_61] : memref<6x16x16xf32, #tpu.memory_space<vmem>>, vector<6x1x16xf32>
    %84 = vector.shape_cast %83 : vector<6x1x16xf32> to vector<6x16xf32>
    %c0_62 = arith.constant 0 : index
    %c11 = arith.constant 11 : index
    %c0_63 = arith.constant 0 : index
    %85 = vector.load %arg9[%c0_62, %c11, %c0_63] : memref<6x16x16xf32, #tpu.memory_space<vmem>>, vector<6x1x16xf32>
    %86 = vector.shape_cast %85 : vector<6x1x16xf32> to vector<6x16xf32>
    %87 = arith.maximumf %84, %86 : vector<6x16xf32>
    %c0_64 = arith.constant 0 : index
    %c12 = arith.constant 12 : index
    %c0_65 = arith.constant 0 : index
    %88 = vector.load %arg9[%c0_64, %c12, %c0_65] : memref<6x16x16xf32, #tpu.memory_space<vmem>>, vector<6x1x16xf32>
    %89 = vector.shape_cast %88 : vector<6x1x16xf32> to vector<6x16xf32>
    %cst_66 = arith.constant 0.000000e+00 : f32
    %90 = vector.broadcast %cst_66 : f32 to vector<6x16xf32>
    %91 = arith.maximumf %89, %90 : vector<6x16xf32>
    %92 = arith.maximumf %87, %91 : vector<6x16xf32>
    %93 = arith.truncf %92 : vector<6x16xf32> to vector<6x16xbf16>
    %c40 = arith.constant 40 : index
    %c0_67 = arith.constant 0 : index
    %94 = vector.load %arg10[%c40, %c0_67] : memref<56x16xbf16, #tpu.memory_space<vmem>>, vector<6x16xbf16>
    tpu.vector_store %arg10[%c40, %c0_67], %93 {strides = array<i32>} : memref<56x16xbf16, #tpu.memory_space<vmem>>, vector<6x16xbf16>,
    %c0_68 = arith.constant 0 : index
    %c0_69 = arith.constant 0 : index
    %95 = vector.load %arg10[%c0_68, %c0_69] : memref<56x16xbf16, #tpu.memory_space<vmem>>, vector<24x16xbf16>
    %c0_70 = arith.constant 0 : index
    %c0_71 = arith.constant 0 : index
    %96 = vector.load %arg11[%c0_70, %c0_71] : memref<24x256xbf16, #tpu.memory_space<vmem>>, vector<24x16xbf16>
    tpu.vector_store %arg11[%c0_70, %c0_71], %95 {strides = array<i32>} : memref<24x256xbf16, #tpu.memory_space<vmem>>, vector<24x16xbf16>,
    %c8_72 = arith.constant 8 : index
    %c0_73 = arith.constant 0 : index
    %97 = vector.load %arg10[%c8_72, %c0_73] : memref<56x16xbf16, #tpu.memory_space<vmem>>, vector<24x16xbf16>
    %c0_74 = arith.constant 0 : index
    %c16_75 = arith.constant 16 : index
    %98 = vector.load %arg11[%c0_74, %c16_75] : memref<24x256xbf16, #tpu.memory_space<vmem>>, vector<24x16xbf16>
    tpu.vector_store %arg11[%c0_74, %c16_75], %97 {strides = array<i32>} : memref<24x256xbf16, #tpu.memory_space<vmem>>, vector<24x16xbf16>,
    %c16_76 = arith.constant 16 : index
    %c0_77 = arith.constant 0 : index
    %99 = vector.load %arg10[%c16_76, %c0_77] : memref<56x16xbf16, #tpu.memory_space<vmem>>, vector<24x16xbf16>
    %c0_78 = arith.constant 0 : index
    %c32_79 = arith.constant 32 : index
    %100 = vector.load %arg11[%c0_78, %c32_79] : memref<24x256xbf16, #tpu.memory_space<vmem>>, vector<24x16xbf16>
    tpu.vector_store %arg11[%c0_78, %c32_79], %99 {strides = array<i32>} : memref<24x256xbf16, #tpu.memory_space<vmem>>, vector<24x16xbf16>,
    %c24_80 = arith.constant 24 : index
    %c0_81 = arith.constant 0 : index
    %101 = vector.load %arg10[%c24_80, %c0_81] : memref<56x16xbf16, #tpu.memory_space<vmem>>, vector<24x16xbf16>
    %c0_82 = arith.constant 0 : index
    %c48 = arith.constant 48 : index
    %102 = vector.load %arg11[%c0_82, %c48] : memref<24x256xbf16, #tpu.memory_space<vmem>>, vector<24x16xbf16>
    tpu.vector_store %arg11[%c0_82, %c48], %101 {strides = array<i32>} : memref<24x256xbf16, #tpu.memory_space<vmem>>, vector<24x16xbf16>,
    %c1_83 = arith.constant 1 : index
    %c0_84 = arith.constant 0 : index
    %103 = vector.load %arg10[%c1_83, %c0_84] : memref<56x16xbf16, #tpu.memory_space<vmem>>, vector<24x16xbf16>
    %c0_85 = arith.constant 0 : index
    %c64 = arith.constant 64 : index
    %104 = vector.load %arg11[%c0_85, %c64] : memref<24x256xbf16, #tpu.memory_space<vmem>>, vector<24x16xbf16>
    tpu.vector_store %arg11[%c0_85, %c64], %103 {strides = array<i32>} : memref<24x256xbf16, #tpu.memory_space<vmem>>, vector<24x16xbf16>,
    %c9_86 = arith.constant 9 : index
    %c0_87 = arith.constant 0 : index
    %105 = vector.load %arg10[%c9_86, %c0_87] : memref<56x16xbf16, #tpu.memory_space<vmem>>, vector<24x16xbf16>
    %c0_88 = arith.constant 0 : index
    %c80 = arith.constant 80 : index
    %106 = vector.load %arg11[%c0_88, %c80] : memref<24x256xbf16, #tpu.memory_space<vmem>>, vector<24x16xbf16>
    tpu.vector_store %arg11[%c0_88, %c80], %105 {strides = array<i32>} : memref<24x256xbf16, #tpu.memory_space<vmem>>, vector<24x16xbf16>,
    %c17 = arith.constant 17 : index
    %c0_89 = arith.constant 0 : index
    %107 = vector.load %arg10[%c17, %c0_89] : memref<56x16xbf16, #tpu.memory_space<vmem>>, vector<24x16xbf16>
    %c0_90 = arith.constant 0 : index
    %c96 = arith.constant 96 : index
    %108 = vector.load %arg11[%c0_90, %c96] : memref<24x256xbf16, #tpu.memory_space<vmem>>, vector<24x16xbf16>
    tpu.vector_store %arg11[%c0_90, %c96], %107 {strides = array<i32>} : memref<24x256xbf16, #tpu.memory_space<vmem>>, vector<24x16xbf16>,
    %c25 = arith.constant 25 : index
    %c0_91 = arith.constant 0 : index
    %109 = vector.load %arg10[%c25, %c0_91] : memref<56x16xbf16, #tpu.memory_space<vmem>>, vector<24x16xbf16>
    %c0_92 = arith.constant 0 : index
    %c112 = arith.constant 112 : index
    %110 = vector.load %arg11[%c0_92, %c112] : memref<24x256xbf16, #tpu.memory_space<vmem>>, vector<24x16xbf16>
    tpu.vector_store %arg11[%c0_92, %c112], %109 {strides = array<i32>} : memref<24x256xbf16, #tpu.memory_space<vmem>>, vector<24x16xbf16>,
    %c2_93 = arith.constant 2 : index
    %c0_94 = arith.constant 0 : index
    %111 = vector.load %arg10[%c2_93, %c0_94] : memref<56x16xbf16, #tpu.memory_space<vmem>>, vector<24x16xbf16>
    %c0_95 = arith.constant 0 : index
    %c128 = arith.constant 128 : index
    %112 = vector.load %arg11[%c0_95, %c128] : memref<24x256xbf16, #tpu.memory_space<vmem>>, vector<24x16xbf16>
    tpu.vector_store %arg11[%c0_95, %c128], %111 {strides = array<i32>} : memref<24x256xbf16, #tpu.memory_space<vmem>>, vector<24x16xbf16>,
    %c10_96 = arith.constant 10 : index
    %c0_97 = arith.constant 0 : index
    %113 = vector.load %arg10[%c10_96, %c0_97] : memref<56x16xbf16, #tpu.memory_space<vmem>>, vector<24x16xbf16>
    %c0_98 = arith.constant 0 : index
    %c144 = arith.constant 144 : index
    %114 = vector.load %arg11[%c0_98, %c144] : memref<24x256xbf16, #tpu.memory_space<vmem>>, vector<24x16xbf16>
    tpu.vector_store %arg11[%c0_98, %c144], %113 {strides = array<i32>} : memref<24x256xbf16, #tpu.memory_space<vmem>>, vector<24x16xbf16>,
    %c18 = arith.constant 18 : index
    %c0_99 = arith.constant 0 : index
    %115 = vector.load %arg10[%c18, %c0_99] : memref<56x16xbf16, #tpu.memory_space<vmem>>, vector<24x16xbf16>
    %c0_100 = arith.constant 0 : index
    %c160 = arith.constant 160 : index
    %116 = vector.load %arg11[%c0_100, %c160] : memref<24x256xbf16, #tpu.memory_space<vmem>>, vector<24x16xbf16>
    tpu.vector_store %arg11[%c0_100, %c160], %115 {strides = array<i32>} : memref<24x256xbf16, #tpu.memory_space<vmem>>, vector<24x16xbf16>,
    %c26 = arith.constant 26 : index
    %c0_101 = arith.constant 0 : index
    %117 = vector.load %arg10[%c26, %c0_101] : memref<56x16xbf16, #tpu.memory_space<vmem>>, vector<24x16xbf16>
    %c0_102 = arith.constant 0 : index
    %c176 = arith.constant 176 : index
    %118 = vector.load %arg11[%c0_102, %c176] : memref<24x256xbf16, #tpu.memory_space<vmem>>, vector<24x16xbf16>
    tpu.vector_store %arg11[%c0_102, %c176], %117 {strides = array<i32>} : memref<24x256xbf16, #tpu.memory_space<vmem>>, vector<24x16xbf16>,
    %c3_103 = arith.constant 3 : index
    %c0_104 = arith.constant 0 : index
    %119 = vector.load %arg10[%c3_103, %c0_104] : memref<56x16xbf16, #tpu.memory_space<vmem>>, vector<24x16xbf16>
    %c0_105 = arith.constant 0 : index
    %c192 = arith.constant 192 : index
    %120 = vector.load %arg11[%c0_105, %c192] : memref<24x256xbf16, #tpu.memory_space<vmem>>, vector<24x16xbf16>
    tpu.vector_store %arg11[%c0_105, %c192], %119 {strides = array<i32>} : memref<24x256xbf16, #tpu.memory_space<vmem>>, vector<24x16xbf16>,
    %c11_106 = arith.constant 11 : index
    %c0_107 = arith.constant 0 : index
    %121 = vector.load %arg10[%c11_106, %c0_107] : memref<56x16xbf16, #tpu.memory_space<vmem>>, vector<24x16xbf16>
    %c0_108 = arith.constant 0 : index
    %c208 = arith.constant 208 : index
    %122 = vector.load %arg11[%c0_108, %c208] : memref<24x256xbf16, #tpu.memory_space<vmem>>, vector<24x16xbf16>
    tpu.vector_store %arg11[%c0_108, %c208], %121 {strides = array<i32>} : memref<24x256xbf16, #tpu.memory_space<vmem>>, vector<24x16xbf16>,
    %c19 = arith.constant 19 : index
    %c0_109 = arith.constant 0 : index
    %123 = vector.load %arg10[%c19, %c0_109] : memref<56x16xbf16, #tpu.memory_space<vmem>>, vector<24x16xbf16>
    %c0_110 = arith.constant 0 : index
    %c224 = arith.constant 224 : index
    %124 = vector.load %arg11[%c0_110, %c224] : memref<24x256xbf16, #tpu.memory_space<vmem>>, vector<24x16xbf16>
    tpu.vector_store %arg11[%c0_110, %c224], %123 {strides = array<i32>} : memref<24x256xbf16, #tpu.memory_space<vmem>>, vector<24x16xbf16>,
    %c27 = arith.constant 27 : index
    %c0_111 = arith.constant 0 : index
    %125 = vector.load %arg10[%c27, %c0_111] : memref<56x16xbf16, #tpu.memory_space<vmem>>, vector<24x16xbf16>
    %c0_112 = arith.constant 0 : index
    %c240 = arith.constant 240 : index
    %126 = vector.load %arg11[%c0_112, %c240] : memref<24x256xbf16, #tpu.memory_space<vmem>>, vector<24x16xbf16>
    tpu.vector_store %arg11[%c0_112, %c240], %125 {strides = array<i32>} : memref<24x256xbf16, #tpu.memory_space<vmem>>, vector<24x16xbf16>,
    %c0_113 = arith.constant 0 : index
    %c0_114 = arith.constant 0 : index
    %127 = vector.load %arg11[%c0_113, %c0_114] : memref<24x256xbf16, #tpu.memory_space<vmem>>, vector<24x256xbf16>
    %c0_115 = arith.constant 0 : index
    %c0_116 = arith.constant 0 : index
    %128 = vector.load %arg4[%c0_115, %c0_116] : memref<256x16xbf16, #tpu.memory_space<vmem>>, vector<256x16xbf16>
    %cst_117 = arith.constant dense<0.000000e+00> : vector<24x16xf32>
    %129 = tpu.matmul %127, %128, %cst_117 {dimension_numbers = #tpu.dot_dimension_numbers<[1], [0], [0], [1], [0, 0, 1, 1], [], []>} : vector<24x256xbf16>, vector<256x16xbf16>, vector<24x16xf32> -> vector<24x16xf32>
    %c0_118 = arith.constant 0 : index
    %c0_119 = arith.constant 0 : index
    %130 = vector.load %arg5[%c0_118, %c0_119] : memref<1x16xf32, #tpu.memory_space<vmem>>, vector<1x16xf32>
    %131 = vector.broadcast %130 : vector<1x16xf32> to vector<24x16xf32>
    %132 = arith.addf %129, %131 : vector<24x16xf32>
    %cst_120 = arith.constant 0.000000e+00 : f32
    %133 = vector.broadcast %cst_120 : f32 to vector<24x16xf32>
    %134 = arith.maximumf %132, %133 : vector<24x16xf32>
    %135 = arith.truncf %134 : vector<24x16xf32> to vector<24x16xbf16>
    %c0_121 = arith.constant 0 : index
    %c0_122 = arith.constant 0 : index
    %136 = vector.load %arg6[%c0_121, %c0_122] : memref<16x128xbf16, #tpu.memory_space<vmem>>, vector<16x128xbf16>
    %cst_123 = arith.constant dense<0.000000e+00> : vector<24x128xf32>
    %137 = tpu.matmul %135, %136, %cst_123 {dimension_numbers = #tpu.dot_dimension_numbers<[1], [0], [0], [1], [0, 0, 1, 1], [], []>} : vector<24x16xbf16>, vector<16x128xbf16>, vector<24x128xf32> -> vector<24x128xf32>
    %c0_124 = arith.constant 0 : index
    %c0_125 = arith.constant 0 : index
    %138 = vector.load %arg7[%c0_124, %c0_125] : memref<1x128xf32, #tpu.memory_space<vmem>>, vector<1x128xf32>
    %139 = vector.broadcast %138 : vector<1x128xf32> to vector<24x128xf32>
    %140 = arith.addf %137, %139 : vector<24x128xf32>
    %c0_126 = arith.constant 0 : index
    %c0_127 = arith.constant 0 : index
    %c0_128 = arith.constant 0 : index
    %141 = vector.load %arg8[%c0_126, %c0_127, %c0_128] : memref<1x24x128xf32, #tpu.memory_space<vmem>>, vector<1x24x128xf32>
    %142 = vector.shape_cast %141 : vector<1x24x128xf32> to vector<24x128xf32>
    %143 = vector.shape_cast %140 : vector<24x128xf32> to vector<1x24x128xf32>
    tpu.vector_store %arg8[%c0_126, %c0_127, %c0_128], %143 {strides = array<i32>} : memref<1x24x128xf32, #tpu.memory_space<vmem>>, vector<1x24x128xf32>,
    return
  }
  func.func @transform_0(%arg0: i32) -> (i32, i32, i32) {
    %c0_i32 = arith.constant 0 : i32
    %c0_i32_0 = arith.constant 0 : i32
    %c0_i32_1 = arith.constant 0 : i32
    return %arg0, %c0_i32, %c0_i32_0 : i32, i32, i32
  }
  func.func @transform_1(%arg0: i32) -> (i32, i32) {
    %c0_i32 = arith.constant 0 : i32
    %c0_i32_0 = arith.constant 0 : i32
    %c0_i32_1 = arith.constant 0 : i32
    return %c0_i32, %c0_i32_0 : i32, i32
  }
  func.func @transform_2(%arg0: i32) -> (i32, i32) {
    %c0_i32 = arith.constant 0 : i32
    %c0_i32_0 = arith.constant 0 : i32
    %c0_i32_1 = arith.constant 0 : i32
    return %c0_i32, %c0_i32_0 : i32, i32
  }
  func.func @transform_3(%arg0: i32) -> (i32, i32) {
    %c0_i32 = arith.constant 0 : i32
    %c0_i32_0 = arith.constant 0 : i32
    %c0_i32_1 = arith.constant 0 : i32
    return %c0_i32, %c0_i32_0 : i32, i32
  }
  func.func @transform_4(%arg0: i32) -> (i32, i32) {
    %c0_i32 = arith.constant 0 : i32
    %c0_i32_0 = arith.constant 0 : i32
    %c0_i32_1 = arith.constant 0 : i32
    return %c0_i32, %c0_i32_0 : i32, i32
  }
  func.func @transform_5(%arg0: i32) -> (i32, i32) {
    %c0_i32 = arith.constant 0 : i32
    %c0_i32_0 = arith.constant 0 : i32
    %c0_i32_1 = arith.constant 0 : i32
    return %c0_i32, %c0_i32_0 : i32, i32
  }
  func.func @transform_6(%arg0: i32) -> (i32, i32) {
    %c0_i32 = arith.constant 0 : i32
    %c0_i32_0 = arith.constant 0 : i32
    %c0_i32_1 = arith.constant 0 : i32
    return %c0_i32, %c0_i32_0 : i32, i32
  }
  func.func @transform_7(%arg0: i32) -> (i32, i32, i32) {
    %c0_i32 = arith.constant 0 : i32
    %c0_i32_0 = arith.constant 0 : i32
    %c0_i32_1 = arith.constant 0 : i32
    return %arg0, %c0_i32, %c0_i32_0 : i32, i32, i32
  }
}

</mosaic_0001>

<bundles_post_ra>
// kernel: tpu_custom_call.1
= control target key start
LH: loop header
LB: loop body
LE: loop exit
PB: predicated region body
PF: predicated region fallthrough
CT: control target
= control target key end

     0   :  { %12 = vsyncpa [#allocation6], 0  ;;  %s3046_s0 = inlined_call_operand.vmem [shape: bf16[2,224,27], index: 0, kind: input, shape index: {}]   ;;  %s3047_s1 = inlined_call_operand.vmem [shape: bf16[27,16], index: 1, kind: input, shape index: {}]   ;;  %s3048_s2 = inlined_call_operand.vmem [shape: f32[1,16], index: 2, kind: input, shape index: {}]   ;;  %s3049_s3 = inlined_call_operand.vmem [shape: bf16[256,16], index: 3, kind: input, shape index: {}]   ;;  %s3050_s4 = inlined_call_operand.vmem [shape: f32[1,16], index: 4, kind: input, shape index: {}]   ;;  %s3051_s5 = inlined_call_operand.vmem [shape: bf16[16,128], index: 5, kind: input, shape index: {}]   ;;  %s3052_s6 = inlined_call_operand.vmem [shape: f32[1,128], index: 6, kind: input, shape index: {}]   ;;  %s3053_s7 = inlined_call_operand.hbm [shape: f32[2,24,128], index: 7, kind: output, shape index: {}]  }
   0x1   :  { %14 = vsyncpa [#allocation6 + $0x1], 0  ;;  %s2269_s24 = smov 0   ;;  %s2271_s25 = smov 0  }
   0x2   :  { %s2273_s26 = smov 0   ;;  %s2275_s27 = smov 0  }
   0x3 LB: > { %s2290_s28 = sadd.s32 4294967295, %s2216_s27   ;;  %s1891_s29 = sadd.s32 4294967294, %s2216_s27   ;;  %s2216_s27 = sphi %s2275_s27, %s3084_s27   ;;  %s2212_s26 = sphi %s2273_s26, %s3083_s26   ;;  %s2208_s25 = sphi %s2271_s25, %s3082_s25   ;;  %s2204_s24 = sphi %s2269_s24, %s3081_s24  }
   0x4   : > { %s2294_s30 = sadd.s32 1, %s2216_s27   ;;  %s179_s8 = sadd.s32 1, %s2212_s26 }
   0x5   : > { %s176_s9 = ssub.s32 %s2216_s27, %s2294_s30  ;;  %p189_p0 = scmp.ne.s32.totalorder %s2212_s26, %s2208_s25 }
   0x6   : > { %p177_p1 = scmp.eq.s32.totalorder %s176_s9, 0  ;;  %p190_p2 = scmp.eq.s32.totalorder %s2290_s28, 1 }
   0x7   : > { %p195_p3 = scmp.ne.s32.totalorder %s2208_s25, %s2204_s24  ;;  %p196_p4 = scmp.eq.s32.totalorder %s1891_s29, 1 }
   0x8   : > { %s2305_s10 = scalar_select %p177_p1, %s2212_s26, %s179_s8  }
   0x9   : > { %p2307_p5 = por %p190_p2, %p189_p0  ;;  %p2311_p6 = por %p196_p4, %p195_p3 }
   0xa   : > { %p1894_p7 = scmp.ge.s32.totalorder %s2216_s27, 1  ;;  %p240_p8 = scmp.lt.s32.totalorder %s2216_s27, 3 }
   0xc   : > { %p241_p9 = pnand %p1894_p7, %p240_p8 }
   0xe   : > { %244 = sbr.rel (%p241_p9) target bundleno = 804 (0x324), region = 48 }
  0x13   : > { %v1958_v0 = vld [vmem:[%s3047_s1 + $0x8] sm:$0xf]  ;;  %v2074_v1 = vld [vmem:[%s3047_s1 + $0x8] sm:$0x30]  ;;  %vm446_vm0 = vcmask 1044480   ;;  %vm447_vm1 = vcmask 1045504  }
  0x14   : > { %v1959_v2 = vor.u32 %v2074_v1, %v1958_v0  ;;  %p272_p10 = scmp.lt.s32.totalorder %s2290_s28, 1  ;;  %v2218_v3 = vmov 65535   ;;  %v2073_v7 = vld [vmem:[%s3047_s1] sm:$0xff]  ;;  %vm403_vm2 = vcmask 220160   ;;  %vm554_vm3 = vcmask 130048   ;;  %s2220_s9 = smov 16  }
  0x15   : > { %v448_v4 = vsel %vm446_vm0, 4294967295, %v2218_v3  ;;  %v2362_v32 = vld [vmem:[%s3048_s2] ss:$0 sm:$0xff]  ;;  %vm622_vm4 = vcmask 1041409   ;;  %vm625_vm5 = vcmask 1042434   ;;  %vm628_vm6 = vcmask 1043459  }
  0x16   : > { %v449_v5 = vsel %vm447_vm1, %v448_v4, 0  ;;  %s273_s17 = scalar_select %p272_p10, %s2290_s28, 1  ;;  %vm278_vm7 = vcmask 125952   ;;  %vm631_vm8 = vcmask 1044484   ;;  %vm634_vm9 = vcmask 1045509  }
  0x17   : > { %v451_v6 = vand.u32 %v1959_v2, %v449_v5  ;;  %vm638_vm10 = vcmask 124928   ;;  %s2221_s13 = smov 32   ;;  %vm1253_vm11 = vcmask 1042432   ;;  %vm1254_vm12 = vcmask 1046532   ;;  %s2222_s14 = smov 48  }
  0x18   : > { %s2099_s18 = smul.u32 112, %s273_s17  ;;  %vm2708_vm13 = vmor %vm1253_vm11, %vm1254_vm12  ;;  %vm1042_vm14 = vsmask.f32 3328  ;;  %vm1043_vm15 = vsmask.f32 7440  ;;  %s2223_s15 = smov 64  }
  0x19   : > { %459 = vmatpush.bf16.msra.mxu0 %v451_v6  ;;  %2094 = vmatpush.bf16.msra.mxu1 %v451_v6  ;;  %vm1366_vm0 = vsmask.f32 2304  ;;  %vm1367_vm1 = vsmask.f32 6416  ;;  %s2224_s16 = smov 80   ;;  %s2225_s17 = smov 96  }
  0x1a   : > { %s2331_s23 = scalar_lea.vmem %s3046_s0, %s2099_s18  ;;  %2095 = vmatpush.bf16.msra.mxu3 %v451_v6  ;;  %s2226_s18 = smov 112   ;;  %vm1190_vm11 = vcmask 913152   ;;  %vm1241_vm12 = vcmask 1044352  }
  0x1b   : > { %v2059_v8 = vld [vmem:[%s2331_s23] sm:$0xff]  ;;  %v2065_v9 = vld [vmem:[%s2331_s23 + $0x30] sm:$0xff]  ;;  %v2060_v11 = vld [vmem:[%s2331_s23 + $0x8] sm:$0xff]  ;;  %s2100_s20 = smul.u32 24, %s2290_s28 }
  0x1c   : > { %v2069_v10 = vld [vmem:[%s2331_s23 + $0x50] sm:$0xff]  ;;  %v2066_v12 = vld [vmem:[%s2331_s23 + $0x38] sm:$0xff]  ;;  %v2067_v15 = vld [vmem:[%s2331_s23 + $0x40] sm:$0xff] }
  0x1d   : > { %460 = vmatpush.bf16.msra.mxu0 %v2073_v7  ;;  %2096 = vmatpush.bf16.msra.mxu1 %v2073_v7  ;;  %v2070_v13 = vld [vmem:[%s2331_s23 + $0x58] sm:$0xff]  ;;  %v2061_v14 = vld [vmem:[%s2331_s23 + $0x10] sm:$0xff]  ;;  %v2071_v16 = vld [vmem:[%s2331_s23 + $0x60] sm:$0xff]  ;;  %s1825_s29 = scalar_lea.hbm %s3053_s7, %s2100_s20 }
  0x1e   : > { %2097 = vmatpush.bf16.msra.mxu3 %v2073_v7  ;;  %v2062_v17 = vld [vmem:[%s2331_s23 + $0x18] sm:$0xff]  ;;  %v2068_v18 = vld [vmem:[%s2331_s23 + $0x48] sm:$0xff]  ;;  %v2063_v19 = vld [vmem:[%s2331_s23 + $0x20] sm:$0xff] }
  0x1f   : > { %v2064_v20 = vld [vmem:[%s2331_s23 + $0x28] sm:$0xff] }
  0x20   : > { %1960 = vmatmul.msk.bf16.vlgmr.msra.gmra.mxu0 %vm403_vm2, %v2059_v8  ;;  %1966 = vmatmul.msk.bf16.vlgmr.msra.gmra.mxu1 %vm403_vm2, %v2065_v9 }
  0x21   : > { %1970 = vmatmul.msk.bf16.vlgmr.msra.gmra.mxu3 %vm403_vm2, %v2069_v10 }
  0x30   : > { %1961 = vmatmul.msk.bf16.gmra.mxu0 %vm403_vm2, %v2060_v11  ;;  %1967 = vmatmul.msk.bf16.gmra.mxu1 %vm403_vm2, %v2066_v12 }
  0x31   : > { %1971 = vmatmul.msk.bf16.gmra.mxu3 %vm403_vm2, %v2070_v13 }
  0x40   : > { %1962 = vmatmul.msk.bf16.gmra.mxu0 %vm403_vm2, %v2061_v14  ;;  %1968 = vmatmul.msk.bf16.gmra.mxu1 %vm403_vm2, %v2067_v15 }
  0x41   : > { %1972 = vmatmul.msk.bf16.gmra.mxu3 %vm403_vm2, %v2071_v16 }
  0x50   : > { %1963 = vmatmul.msk.bf16.gmra.mxu0 %vm403_vm2, %v2062_v17  ;;  %1969 = vmatmul.msk.bf16.gmra.mxu1 %vm403_vm2, %v2068_v18 }
  0x60   : > { %1964 = vmatmul.msk.bf16.gmra.mxu0 %vm403_vm2, %v2063_v19 }
  0x70   : > { %1965 = vmatmul.msk.bf16.gmra.mxu0 %vm403_vm2, %v2064_v20 }
  0x9d   : > { %v462_v21 = vpop.f32.mrf.mxu0  ;;  %v492_v22 = vpop.f32.mrf.mxu1 }
  0x9e   : > { %v2365_v33 = vadd.f32 %v2362_v32, %v492_v22  ;;  %v463_v36 = vadd.f32 %v2362_v32, %v462_v21 }
  0xa4   : > { %v512_v23 = vpop.f32.mrf.mxu3 }
  0xa5   : > { %v464_v24 = vpop.f32.mrf.mxu0  ;;  %v494_v25 = vpop.f32.mrf.mxu1  ;;  %v513_v46 = vadd.f32 %v2362_v32, %v512_v23 }
  0xa6   : > { %v2379_v48 = vadd.f32 %v2362_v32, %v494_v25  ;;  %v465_v51 = vadd.f32 %v2362_v32, %v464_v24 }
  0xac   : > { %v514_v26 = vpop.f32.mrf.mxu3 }
  0xad   : > { %v467_v27 = vpop.f32.mrf.mxu0  ;;  %v497_v28 = vpop.f32.mrf.mxu1  ;;  %v2403_v14 = vadd.f32 %v2362_v32, %v514_v26 }
  0xae   : > { %v498_v34 = vadd.f32 %v2362_v32, %v497_v28  ;;  %v468_v35 = vadd.f32 %v2362_v32, %v467_v27 }
  0xb0   : > { %v536_v37 = vmax.f32 %v2365_v33, %v498_v34  ;;  %v530_v41 = vmax.f32 %v463_v36, %v468_v35 }
  0xb4   : > { %v517_v29 = vpop.f32.mrf.mxu3 }
  0xb5   : > { %v469_v30 = vpop.f32.mrf.mxu0  ;;  %v499_v31 = vpop.f32.mrf.mxu1  ;;  %v518_v47 = vadd.f32 %v2362_v32, %v517_v29 }
  0xb6   : > { %v470_v49 = vadd.f32 %v2362_v32, %v469_v30  ;;  %v500_v50 = vadd.f32 %v2362_v32, %v499_v31 }
  0xb7   : > { %v540_v53 = vmax.f32 %v513_v46, %v518_v47 }
  0xb8   : > { %v531_v57 = vmax.f32 %v465_v51, %v470_v49  ;;  %v537_v58 = vmax.f32 %v2379_v48, %v500_v50 }
  0xbc   : > { %v519_v38 = vpop.f32.mrf.mxu3 }
  0xbd   : > { %v472_v39 = vpop.f32.mrf.mxu0  ;;  %v502_v40 = vpop.f32.mrf.mxu1  ;;  %v520_v17 = vadd.f32 %v2362_v32, %v519_v38 }
  0xbe   : > { %v2372_v42 = vadd.f32 %v2362_v32, %v472_v39  ;;  %v503_v43 = vadd.f32 %v2362_v32, %v502_v40 }
  0xbf   : > { %v541_v34 = vmax.f32 %v2403_v14, %v520_v17 }
  0xc0   : > { %v542_v44 = vmax.f32 %v530_v41, %v2372_v42  ;;  %v548_v45 = vmax.f32 %v536_v37, %v503_v43 }
  0xc2   : > { %555 = vst.msk [vmem:[#allocation2] sm:$0xff] %vm554_vm3, %v542_v44 }
  0xc3   : > { %561 = vst.msk [vmem:[#allocation2 + $0x30] sm:$0xff] %vm554_vm3, %v548_v45 }
  0xc4   : > { %v522_v52 = vpop.f32.mrf.mxu3 }
  0xc5   : > { %v474_v54 = vpop.f32.mrf.mxu0  ;;  %v504_v55 = vpop.f32.mrf.mxu1  ;;  %v523_v56 = vadd.f32 %v2362_v32, %v522_v52 }
  0xc6   : > { %v2389_v59 = vadd.f32 %v2362_v32, %v474_v54  ;;  %v2392_v60 = vadd.f32 %v2362_v32, %v504_v55 }
  0xc7   : > { %v552_v63 = vmax.f32 %v540_v53, %v523_v56 }
  0xc8   : > { %v543_v61 = vmax.f32 %v531_v57, %v2389_v59  ;;  %v549_v62 = vmax.f32 %v537_v58, %v2392_v60 }
  0xc9   : > { %565 = vst.msk [vmem:[#allocation2 + $0x50] sm:$0xff] %vm554_vm3, %v552_v63  ;;  %v567_v4 = vld [vmem:[#allocation2] sm:$0x1]  ;;  %v573_v5 = vld [vmem:[#allocation2 + $0x1] sm:$0x1] }
  0xca   : > { %556 = vst.msk [vmem:[#allocation2 + $0x8] sm:$0xff] %vm554_vm3, %v543_v61  ;;  %v585_v8 = vld [vmem:[#allocation2 + $0x2] sm:$0x1]  ;;  %v646_v10 = vld [vmem:[#allocation2 + $0x3] sm:$0x1]  ;;  %v579_v22 = vmax.f32 %v567_v4, %v573_v5 }
  0xcb   : > { %562 = vst.msk [vmem:[#allocation2 + $0x38] sm:$0xff] %vm554_vm3, %v549_v62  ;;  %v640_v9 = vld [vmem:[#allocation2 + $0x2] sm:$0x1]  ;;  %v570_v11 = vld [vmem:[#allocation2 + $0x30] sm:$0x1]  ;;  %v591_v23 = vmax.f32 %v585_v8, 0.0 }
  0xcc   : > { %v576_v12 = vld [vmem:[#allocation2 + $0x31] sm:$0x1]  ;;  %v588_v13 = vld [vmem:[#allocation2 + $0x32] sm:$0x1]  ;;  %v658_v15 = vld [vmem:[#allocation2 + $0x4] sm:$0x1]  ;;  %v524_v21 = vpop.f32.mrf.mxu3  ;;  %v652_v29 = vmax.f32 %v640_v9, %v646_v10 }
  0xcd   : > { %v477_v0 = vpop.f32.mrf.mxu0  ;;  %v507_v1 = vpop.f32.mrf.mxu1  ;;  %v707_v16 = vld [vmem:[#allocation2 + $0x4] sm:$0x1]  ;;  %v713_v18 = vld [vmem:[#allocation2 + $0x5] sm:$0x1]  ;;  %v725_v19 = vld [vmem:[#allocation2 + $0x6] sm:$0x1]  ;;  %v582_v24 = vmax.f32 %v570_v11, %v576_v12  ;;  %v525_v35 = vadd.f32 %v2362_v32, %v524_v21  ;;  %v2409_v41 = vmax.f32 %v579_v22, %v591_v23 }
  0xce   : > { %v508_v2 = vadd.f32 %v2362_v32, %v507_v1  ;;  %v643_v20 = vld [vmem:[#allocation2 + $0x32] sm:$0x1]  ;;  %v594_v25 = vmax.f32 %v588_v13, 0.0  ;;  %v649_v27 = vld [vmem:[#allocation2 + $0x33] sm:$0x1]  ;;  %v664_v30 = vmax.f32 %v658_v15, 0.0  ;;  %v719_v26 = vmax.f32 %v707_v16, %v713_v18 }
  0xcf   : > { %v661_v28 = vld [vmem:[#allocation2 + $0x34] sm:$0x1]  ;;  %v731_v31 = vmax.f32 %v725_v19, 0.0  ;;  %v655_v36 = vmax.f32 %v643_v20, %v649_v27  ;;  %v728_v39 = vld [vmem:[#allocation2 + $0x36] sm:$0x1]  ;;  %v478_v57 = vadd.f32 %v2362_v32, %v477_v0  ;;  %v553_v58 = vmax.f32 %v541_v34, %v525_v35 }
  0xd0   : > { %v538_v3 = vmax.f32 %v503_v43, %v508_v2  ;;  %v667_v37 = vmax.f32 %v661_v28, 0.0  ;;  %v710_v38 = vld [vmem:[#allocation2 + $0x34] sm:$0x1]  ;;  %v2411_v43 = vld [vmem:[#allocation2 + $0x6] sm:$0x1]  ;;  %v600_v44 = vmax.f32 %v582_v24, %v594_v25  ;;  %v2415_v49 = vmax.f32 %v652_v29, %v664_v30 }
  0xd1   : > { %v716_v45 = vld [vmem:[#allocation2 + $0x35] sm:$0x1]  ;;  %v2417_v50 = vld [vmem:[#allocation2 + $0x7] sm:$0x1]  ;;  %v777_v51 = vld [vmem:[#allocation2 + $0x36] sm:$0x1]  ;;  %v2419_v53 = vmax.f32 %v719_v26, %v731_v31  ;;  %v603_v5 = vpack.c.bf16 %v2409_v41, %v2409_v41  ;;  %v532_v23 = vmax.f32 %v2372_v42, %v478_v57 }
  0xd2   : > { %v550_v6 = vmax.f32 %v538_v3, %v513_v46  ;;  %v2413_v46 = vld [vmem:[#allocation2 + $0x8] sm:$0x1]  ;;  %v795_v47 = vld [vmem:[#allocation2 + $0x38] sm:$0x1]  ;;  %v783_v52 = vld [vmem:[#allocation2 + $0x37] sm:$0x1]  ;;  %v2426_v61 = vmax.f32 %v655_v36, %v667_v37  ;;  %v722_v62 = vmax.f32 %v710_v38, %v716_v45  ;;  %v676_v11 = vpack.c.bf16 %v2415_v49, %v2415_v49 }
  0xd3   : > { %v734_v54 = vmax.f32 %v728_v39, 0.0  ;;  %v2421_v55 = vld [vmem:[#allocation2 + $0xa] sm:$0x1]  ;;  %v2423_v56 = vld [vmem:[#allocation2 + $0x52] sm:$0x1]  ;;  %v798_v63 = vmax.f32 %v2413_v46, 0.0  ;;  %v786_v12 = vmax.f32 %v2411_v43, %v2417_v50  ;;  %v743_v18 = vpack.c.bf16 %v2419_v53, %v2419_v53 }
  0xd4   : > { %563 = vst.msk [vmem:[#allocation2 + $0x40] sm:$0xff] %vm554_vm3, %v550_v6  ;;  %v2429_v1 = vld [vmem:[#allocation2 + $0x8] sm:$0x1]  ;;  %v2431_v2 = vld [vmem:[#allocation2 + $0x9] sm:$0x1]  ;;  %v801_v3 = vmax.f32 %v795_v47, 0.0  ;;  %v606_v6 = vpack.c.bf16 %v600_v44, %v600_v44  ;;  %v789_v19 = vmax.f32 %v777_v51, %v783_v52  ;;  %v679_v24 = vpack.c.bf16 %v2426_v61, %v2426_v61 }
  0xd5   : > { %v2400_v7 = vpop.f32.mrf.mxu0  ;;  %v2433_v4 = vld [vmem:[#allocation2 + $0x54] sm:$0x1]  ;;  %v2437_v8 = vld [vmem:[#allocation2 + $0x50] sm:$0x1]  ;;  %v2439_v0 = vld [vmem:[#allocation2 + $0x51] sm:$0x1]  ;;  %v509_v10 = vpop.f32.mrf.mxu1  ;;  %v740_v25 = vmax.f32 %v722_v62, %v734_v54  ;;  %v853_v42 = vmax.f32 %v2429_v1, %v2431_v2 }
  0xd6   : > { %v2441_v9 = vld [vmem:[#allocation2 + $0x52] sm:$0x1]  ;;  %v865_v13 = vmax.f32 %v2421_v55, 0.0  ;;  %v596_v15 = vmax.f32 %v2423_v56, 0.0  ;;  %v651_v16 = vld [vmem:[#allocation2 + $0x53] sm:$0x1]  ;;  %v480_v30 = vadd.f32 %v2362_v32, %v2400_v7  ;;  %v510_v26 = vadd.f32 %v2362_v32, %v509_v10 }
  0xd7   : > { %v2449_v17 = vld [vmem:[#allocation2 + $0x54] sm:$0x1]  ;;  %v669_v20 = vmax.f32 %v2433_v4, 0.0  ;;  %v718_v21 = vld [vmem:[#allocation2 + $0x55] sm:$0x1]  ;;  %566 = vst.msk [vmem:[#allocation2 + $0x58] sm:$0xff] %vm554_vm3, %v553_v58  ;;  %v2461_v34 = vunpack.c.l.b16 %v606_v6  ;;  %v807_v36 = vmax.f32 %v789_v19, %v801_v3  ;;  %v584_v44 = vmax.f32 %v2437_v8, %v2439_v0 }
  0xd8   : > { %v730_v22 = vld [vmem:[#allocation2 + $0x56] sm:$0x1]  ;;  %v908_v35 = vld [vmem:[#allocation2 + $0xa] sm:$0x1]  ;;  %v657_v7 = vmax.f32 %v2441_v9, %v651_v16  ;;  %v724_v45 = vmax.f32 %v2449_v17, %v718_v21  ;;  %v539_v52 = vmax.f32 %v2392_v60, %v510_v26  ;;  %v914_v54 = vld [vmem:[#allocation2 + $0xb] sm:$0x1]  ;;  %v533_v57 = vmax.f32 %v2389_v59, %v480_v30 }
  0xd9   : > { %v926_v55 = vld [vmem:[#allocation2 + $0xc] sm:$0x1]  ;;  %v736_v56 = vmax.f32 %v730_v22, 0.0  ;;  %v844_v3 = vld [vmem:[#allocation2 + $0x38] sm:$0x1]  ;;  %v746_v0 = vpack.c.bf16 %v740_v25, %v740_v25  ;;  %v2483_v59 = vmax.f32 %v786_v12, %v798_v63  ;;  %v920_v9 = vmax.f32 %v908_v35, %v914_v54 }
  0xda   : > { %v551_v2 = vmax.f32 %v539_v52, %v2403_v14  ;;  %v932_v10 = vmax.f32 %v926_v55, 0.0  ;;  %v850_v16 = vld [vmem:[#allocation2 + $0x39] sm:$0x1]  ;;  %v862_v17 = vld [vmem:[#allocation2 + $0x3a] sm:$0x1]  ;;  %v2486_v14 = vunpack.c.l.b16 %v679_v24  ;;  %v2488_v19 = vmax.f32 %v853_v42, %v865_v13 }
  0xdb   : > { %v571_v27 = vld [vmem:[#allocation2 + $0x40] sm:$0x1]  ;;  %v577_v28 = vld [vmem:[#allocation2 + $0x41] sm:$0x1]  ;;  %v589_v29 = vld [vmem:[#allocation2 + $0x42] sm:$0x1]  ;;  %v813_v63 = vpack.c.bf16 %v807_v36, %v807_v36  ;;  %v742_v25 = vmax.f32 %v724_v45, %v736_v56  ;;  %v856_v30 = vmax.f32 %v844_v3, %v850_v16  ;;  %v2493_v13 = vunpack.c.l.b16 %v746_v0 }
  0xdc   : > { %v644_v37 = vld [vmem:[#allocation2 + $0x42] sm:$0x1]  ;;  %v650_v38 = vld [vmem:[#allocation2 + $0x43] sm:$0x1]  ;;  %v662_v39 = vld [vmem:[#allocation2 + $0x44] sm:$0x1]  ;;  %v583_v61 = vmax.f32 %v571_v27, %v577_v28  ;;  %v675_v27 = vmax.f32 %v657_v7, %v669_v20  ;;  %v2495_v42 = vmax.f32 %v920_v9, %v932_v10 }
  0xdd   : > { %v482_v40 = vpop.f32.mrf.mxu0  ;;  %v711_v47 = vld [vmem:[#allocation2 + $0x44] sm:$0x1]  ;;  %v717_v50 = vld [vmem:[#allocation2 + $0x45] sm:$0x1]  ;;  %v729_v51 = vld [vmem:[#allocation2 + $0x46] sm:$0x1]  ;;  %v656_v1 = vmax.f32 %v644_v37, %v650_v38  ;;  %v748_v7 = vpack.c.bf16 %v742_v25, %v742_v25 }
  0xde   : > { %v2466_v43 = vadd.f32 %v2362_v32, %v482_v40  ;;  %v595_v62 = vmax.f32 %v589_v29, 0.0  ;;  %v668_v4 = vmax.f32 %v662_v39, 0.0  ;;  %v723_v6 = vmax.f32 %v711_v47, %v717_v50  ;;  %564 = vst.msk [vmem:[#allocation2 + $0x48] sm:$0xff] %vm554_vm3, %v551_v2  ;;  %v911_v21 = vld [vmem:[#allocation2 + $0x3a] sm:$0x1] }
  0xdf   : > { %v735_v8 = vmax.f32 %v729_v51, 0.0  ;;  %v917_v22 = vld [vmem:[#allocation2 + $0x3b] sm:$0x1]  ;;  %v929_v12 = vld [vmem:[#allocation2 + $0x3c] sm:$0x1]  ;;  %v681_v38 = vpack.c.bf16 %v675_v27, %v675_v27  ;;  %v810_v39 = vpack.c.bf16 %v2483_v59, %v2483_v59  ;;  %v2518_v10 = vunpack.c.l.b16 %v748_v7 }
  0xe0   : > { %v544_v40 = vmax.f32 %v532_v23, %v2466_v43  ;;  %v602_v23 = vmax.f32 %v584_v44, %v596_v15  ;;  %v601_v28 = vmax.f32 %v583_v61, %v595_v62  ;;  %v674_v26 = vmax.f32 %v656_v1, %v668_v4  ;;  %v779_v45 = vld [vmem:[#allocation2 + $0x56] sm:$0x1]  ;;  %v785_v47 = vld [vmem:[#allocation2 + $0x57] sm:$0x1]  ;;  %v797_v1 = vld [vmem:[#allocation2 + $0x58] sm:$0x1] }
  0xe1   : > { %v868_v15 = vmax.f32 %v862_v17, 0.0  ;;  %v923_v20 = vmax.f32 %v911_v21, %v917_v22  ;;  %v935_v35 = vmax.f32 %v929_v12, 0.0  ;;  %v2500_v44 = vunpack.c.l.b16 %v813_v63  ;;  %v864_v0 = vld [vmem:[#allocation2 + $0x5a] sm:$0x1] }
  0xe2   : > { %557 = vst.msk [vmem:[#allocation2 + $0x10] sm:$0xff] %vm554_vm3, %v544_v40  ;;  %v608_v37 = vpack.c.bf16 %v602_v23, %v602_v23  ;;  %v607_v50 = vpack.c.bf16 %v601_v28, %v601_v28  ;;  %v680_v52 = vpack.c.bf16 %v674_v26, %v674_v26  ;;  %v944_v61 = vpack.c.bf16 %v2495_v42, %v2495_v42 }
  0xe3   : > { %3057 = vst [vmem:[#allocation8_spill] sm:$0xff] %v2500_v44  ;;  %v2509_v62 = vmax.f32 %v856_v30, %v868_v15  ;;  %v2511_v3 = vmax.f32 %v923_v20, %v935_v35  ;;  %v803_v27 = vmax.f32 %v797_v1, 0.0  ;;  %v2531_v35 = vld [vmem:[#allocation2 + $0x5c] sm:$0x1]  ;;  %v2543_v1 = vld [vmem:[#allocation2 + $0x5b] sm:$0x1]  ;;  %v2572_v41 = vunpack.c.l.b16 %v810_v39 }
  0xe4   : > { %v2513_v4 = vunpack.c.l.b16 %v608_v37  ;;  %v2520_v16 = vunpack.c.l.b16 %v607_v50  ;;  %v2523_v22 = vunpack.c.l.b16 %v680_v52  ;;  %v2576_v49 = vunpack.c.l.b16 %v944_v61 }
  0xe5   : > { %v484_v31 = vpop.f32.mrf.mxu0  ;;  %v880_v42 = vpack.c.bf16 %v2509_v62, %v2509_v62  ;;  %v796_v37 = vld [vmem:[#allocation2 + $0x48] sm:$0x1]  ;;  %v2541_v62 = vld [vmem:[#allocation2 + $0x5a] sm:$0x1] }
  0xe6   : > { %v2476_v58 = vadd.f32 %v2362_v32, %v484_v31  ;;  %v741_v31 = vmax.f32 %v723_v6, %v735_v8  ;;  %v2515_v6 = vunpack.c.l.b16 %v681_v38  ;;  %v791_v8 = vmax.f32 %v779_v45, %v785_v47  ;;  %v778_v45 = vld [vmem:[#allocation2 + $0x46] sm:$0x1]  ;;  %v784_v47 = vld [vmem:[#allocation2 + $0x47] sm:$0x1] }
  0xe8   : > { %v545_v60 = vmax.f32 %v533_v57, %v2476_v58  ;;  %v747_v54 = vpack.c.bf16 %v741_v31, %v741_v31 }
  0xe9   : > { %v568_v55 = vld [vmem:[#allocation2 + $0x10] sm:$0x1]  ;;  %v574_v56 = vld [vmem:[#allocation2 + $0x11] sm:$0x1]  ;;  %v586_v2 = vld [vmem:[#allocation2 + $0x12] sm:$0x1] }
  0xea   : > { %558 = vst.msk [vmem:[#allocation2 + $0x18] sm:$0xff] %vm554_vm3, %v545_v60  ;;  %v852_v60 = vld [vmem:[#allocation2 + $0x59] sm:$0x1]  ;;  %v580_v17 = vmax.f32 %v568_v55, %v574_v56  ;;  %v647_v21 = vld [vmem:[#allocation2 + $0x13] sm:$0x1]  ;;  %v2525_v23 = vunpack.c.l.b16 %v747_v54  ;;  %v592_v63 = vmax.f32 %v586_v2, 0.0  ;;  %v947_v54 = vpack.c.bf16 %v2511_v3, %v2511_v3 }
  0xeb   : > { %v659_v12 = vld [vmem:[#allocation2 + $0x14] sm:$0x1]  ;;  %v714_v31 = vld [vmem:[#allocation2 + $0x15] sm:$0x1]  ;;  %v2590_v39 = vld [vmem:[#allocation2 + $0x17] sm:$0x1] }
  0xec   : > { %v708_v25 = vld [vmem:[#allocation2 + $0x14] sm:$0x1]  ;;  %v665_v26 = vmax.f32 %v659_v12, 0.0  ;;  %v598_v50 = vmax.f32 %v580_v17, %v592_v63  ;;  %v2550_v17 = vld [vmem:[#allocation2 + $0x49] sm:$0x1] }
  0xed   : > { %v487_v29 = vpop.f32.mrf.mxu0  ;;  %v720_v38 = vmax.f32 %v708_v25, %v714_v31  ;;  %v790_v31 = vmax.f32 %v778_v45, %v784_v47 }
  0xee   : > { %v488_v24 = vadd.f32 %v2362_v32, %v487_v29  ;;  %v870_v29 = vmax.f32 %v864_v0, 0.0  ;;  %v2548_v0 = vld [vmem:[#allocation2 + $0x48] sm:$0x1]  ;;  %v604_v53 = vpack.c.bf16 %v598_v50, %v598_v50 }
  0xf0   : > { %v534_v36 = vmax.f32 %v2466_v43, %v488_v24  ;;  %v877_v43 = vpack.c.bf16 %v2488_v19, %v2488_v19  ;;  %v641_v19 = vld [vmem:[#allocation2 + $0x12] sm:$0x1]  ;;  %v726_v24 = vld [vmem:[#allocation2 + $0x16] sm:$0x1]  ;;  %v616_v56 = vunpack.c.l.b16 %v604_v53 }
  0xf1   : > { %v653_v30 = vmax.f32 %v641_v19, %v647_v21  ;;  %v732_v52 = vmax.f32 %v726_v24, 0.0  ;;  %v2555_v19 = vunpack.c.l.b16 %v603_v5  ;;  %v2565_v21 = vunpack.c.l.b16 %v743_v18  ;;  %v2582_v18 = vld [vmem:[#allocation2 + $0x16] sm:$0x1]  ;;  %v793_v50 = vld [vmem:[#allocation2 + $0x18] sm:$0x1] }
  0xf2   : > { %v546_v57 = vmax.f32 %v534_v36, %v2365_v33  ;;  %v846_v33 = vld [vmem:[#allocation2 + $0x58] sm:$0x1]  ;;  %v2574_v5 = vunpack.c.l.b16 %v877_v43  ;;  %v787_v55 = vmax.f32 %v2582_v18, %v2590_v39  ;;  %v860_v40 = vld [vmem:[#allocation2 + $0x1a] sm:$0x1]  ;;  %v927_v44 = vld [vmem:[#allocation2 + $0x1c] sm:$0x1] }
  0xf3   : > { %v858_v28 = vmax.f32 %v846_v33, %v852_v60  ;;  %v802_v60 = vmax.f32 %v796_v37, 0.0  ;;  %v671_v3 = vmax.f32 %v653_v30, %v665_v26  ;;  %v738_v63 = vmax.f32 %v720_v38, %v732_v52  ;;  %v842_v38 = vld [vmem:[#allocation2 + $0x18] sm:$0x1]  ;;  %v909_v9 = vld [vmem:[#allocation2 + $0x1a] sm:$0x1] }
  0xf4   : > { %559 = vst.msk [vmem:[#allocation2 + $0x20] sm:$0xff] %vm554_vm3, %v546_v57  ;;  %v2539_v57 = vmax.f32 %v791_v8, %v803_v27  ;;  %v2560_v8 = vunpack.c.l.b16 %v676_v11  ;;  %v2567_v27 = vld [vmem:[#allocation2 + $0x4a] sm:$0x1]  ;;  %v2584_v30 = vunpack.c.l.b16 %v880_v42  ;;  %v2586_v26 = vunpack.c.l.b16 %v947_v54  ;;  %v930_v18 = vld [vmem:[#allocation2 + $0x4c] sm:$0x1] }
  0xf5   : > { %v2545_v2 = vmax.f32 %v858_v28, %v870_v29  ;;  %v2578_v11 = vld [vmem:[#allocation2 + $0x4a] sm:$0x1]  ;;  %v2580_v28 = vld [vmem:[#allocation2 + $0x4b] sm:$0x1]  ;;  %v489_v24 = vpop.f32.mrf.mxu0  ;;  %v677_v42 = vpack.c.bf16 %v671_v3, %v671_v3  ;;  %v744_v59 = vpack.c.bf16 %v738_v63, %v738_v63  ;;  %v2599_v37 = vmax.f32 %v790_v31, %v802_v60  ;;  %v848_v3 = vld [vmem:[#allocation2 + $0x19] sm:$0x1] }
  0xf6   : > { %v799_v54 = vmax.f32 %v793_v50, 0.0  ;;  %v915_v60 = vld [vmem:[#allocation2 + $0x1b] sm:$0x1]  ;;  %v854_v46 = vmax.f32 %v842_v38, %v848_v3 }
  0xf7   : > { %v689_v51 = vunpack.c.l.b16 %v677_v42  ;;  %v756_v7 = vunpack.c.l.b16 %v744_v59  ;;  %v921_v39 = vmax.f32 %v909_v9, %v915_v60  ;;  %v933_v59 = vmax.f32 %v927_v44, 0.0 }
  0xf8   : > { %v805_v9 = vmax.f32 %v787_v55, %v799_v54  ;;  %v3059_v54 = vrot.slane %v2520_v16, 4 }
  0xf9   : > { %v694_v42 = vrot.slane %v689_v51, 7 }
  0xfb   : > { %v569_v12 = vld [vmem:[#allocation2 + $0x20] sm:$0x1]  ;;  %v575_v25 = vld [vmem:[#allocation2 + $0x21] sm:$0x1]  ;;  %v587_v29 = vld [vmem:[#allocation2 + $0x22] sm:$0x1]  ;;  %v695_v44 = vsel %vm622_vm4, %v694_v42, %v2560_v8 }
  0xfc   : > { %v642_v43 = vld [vmem:[#allocation2 + $0x22] sm:$0x1]  ;;  %v648_v61 = vld [vmem:[#allocation2 + $0x23] sm:$0x1]  ;;  %v581_v52 = vmax.f32 %v569_v12, %v575_v25  ;;  %v660_v45 = vld [vmem:[#allocation2 + $0x24] sm:$0x1]  ;;  %v490_v12 = vadd.f32 %v2362_v32, %v489_v24  ;;  %v924_v25 = vmax.f32 %v2578_v11, %v2580_v28 }
  0xfd   : > { %v709_v47 = vld [vmem:[#allocation2 + $0x24] sm:$0x1]  ;;  %v593_v33 = vmax.f32 %v587_v29, 0.0  ;;  %v715_v36 = vld [vmem:[#allocation2 + $0x25] sm:$0x1]  ;;  %v654_v15 = vmax.f32 %v642_v43, %v648_v61  ;;  %v666_v29 = vmax.f32 %v660_v45, 0.0 }
  0xfe   : > { %v727_v20 = vld [vmem:[#allocation2 + $0x26] sm:$0x1]  ;;  %v721_v31 = vmax.f32 %v709_v47, %v715_v36  ;;  %v621_v32 = vrot.slane %v616_v56, 7  ;;  %v866_v24 = vmax.f32 %v860_v40, 0.0  ;;  %v535_v28 = vmax.f32 %v2476_v58, %v490_v12 }
  0xff   : > { %v599_v63 = vmax.f32 %v581_v52, %v593_v33  ;;  %v733_v53 = vmax.f32 %v727_v20, 0.0  ;;  %v672_v61 = vmax.f32 %v654_v15, %v666_v29  ;;  %v761_v20 = vrot.slane %v756_v7, 7 }
 0x100   : > { %v547_v36 = vmax.f32 %v535_v28, %v2379_v48  ;;  %v2219_v15 = vmov 0   ;;  %v936_v40 = vmax.f32 %v930_v18, 0.0  ;;  %v623_v58 = vsel %vm622_vm4, %v621_v32, %v2555_v19 }
 0x101   : > { %v605_v43 = vpack.c.bf16 %v599_v63, %v599_v63  ;;  %v739_v11 = vmax.f32 %v721_v31, %v733_v53  ;;  %v678_v52 = vpack.c.bf16 %v672_v61, %v672_v61  ;;  %281 = vst.msk [vmem:[#allocation3 + $0x8] sm:$0xf] %vm278_vm7, %v2219_v15  ;;  %v872_v51 = vmax.f32 %v854_v46, %v866_v24  ;;  %v776_v31 = vld [vmem:[#allocation2 + $0x26] sm:$0x1]  ;;  %v782_v53 = vld [vmem:[#allocation2 + $0x27] sm:$0x1] }
 0x102   : > { %560 = vst.msk [vmem:[#allocation2 + $0x28] sm:$0xff] %vm554_vm3, %v547_v36  ;;  %v3058_v7 = vrot.slane %v2461_v34, 5  ;;  %v762_v55 = vsel %vm622_vm4, %v761_v20, %v2565_v21  ;;  %v939_v46 = vmax.f32 %v921_v39, %v933_v59  ;;  %v3060_v34 = vmax.f32 %v2567_v27, 0.0 }
 0x103   : > { %v617_v33 = vunpack.c.l.b16 %v605_v43  ;;  %v745_v50 = vpack.c.bf16 %v739_v11, %v739_v11  ;;  %v690_v45 = vunpack.c.l.b16 %v678_v52  ;;  %279 = vst.msk [vmem:[#allocation3] sm:$0xf] %vm278_vm7, %v2219_v15  ;;  %v3061_v63 = vmax.f32 %v2548_v0, %v2550_v17 }
 0x104   : > { %280 = vst.msk [vmem:[#allocation3 + $0x4] sm:$0xf] %vm278_vm7, %v2219_v15  ;;  %v2632_v60 = vmax.f32 %v924_v25, %v936_v40  ;;  %v3062_v43 = vrot.slane %v2486_v14, 5  ;;  %v811_v61 = vpack.c.bf16 %v805_v9, %v805_v9  ;;  %v3063_v32 = vrot.slane %v2493_v13, 5 }
 0x105   : > { %v624_v38 = vrot.slane %v617_v33, 6  ;;  %v757_v56 = vunpack.c.l.b16 %v745_v50  ;;  %v696_v48 = vrot.slane %v690_v45, 6  ;;  %282 = vst.msk [vmem:[#allocation3 + $0xc] sm:$0xf] %vm278_vm7, %v2219_v15  ;;  %v875_v29 = vmax.f32 %v3061_v63, %v3060_v34 }
 0x106   : > { %283 = vst.msk [vmem:[#allocation3 + $0x10] sm:$0xf] %vm278_vm7, %v2219_v15  ;;  %v3064_v0 = vrot.slane %v2523_v22, 4  ;;  %v3065_v25 = vrot.slane %v2513_v4, 3  ;;  %v878_v11 = vpack.c.bf16 %v872_v51, %v872_v51  ;;  %v3066_v14 = vrot.slane %v2525_v23, 4 }
 0x107   : > { %v626_v47 = vsel %vm625_vm5, %v624_v38, %v623_v58  ;;  %v763_v12 = vrot.slane %v757_v56, 6  ;;  %v697_v19 = vsel %vm625_vm5, %v696_v48, %v695_v44  ;;  %284 = vst.msk [vmem:[#allocation3 + $0x14] sm:$0xf] %vm278_vm7, %v2219_v15  ;;  %v3067_v13 = vrot.slane %v2515_v6, 3 }
 0x108   : > { %v629_v3 = vsel %vm628_vm6, %v3058_v7, %v626_v47  ;;  %v699_v16 = vsel %vm628_vm6, %v3062_v43, %v697_v19  ;;  %285 = vst.msk [vmem:[#allocation3 + $0x18] sm:$0xf] %vm278_vm7, %v2219_v15  ;;  %v945_v39 = vpack.c.bf16 %v939_v46, %v939_v46  ;;  %v788_v22 = vmax.f32 %v776_v31, %v782_v53 }
 0x109   : > { %v632_v8 = vsel %vm631_vm8, %v3059_v54, %v629_v3  ;;  %v764_v21 = vsel %vm625_vm5, %v763_v12, %v762_v55  ;;  %v701_v17 = vsel %vm631_vm8, %v3064_v0, %v699_v16  ;;  %v794_v33 = vld [vmem:[#allocation2 + $0x28] sm:$0x1]  ;;  %v849_v42 = vld [vmem:[#allocation2 + $0x29] sm:$0x1]  ;;  %v3068_v4 = vrot.slane %v2518_v10, 3 }
 0x10a   : > { %v766_v27 = vsel %vm628_vm6, %v3063_v32, %v764_v21  ;;  %v635_v24 = vsel %vm634_vm9, %v3065_v25, %v632_v8  ;;  %v703_v18 = vsel %vm634_vm9, %v3067_v13, %v701_v17  ;;  %v843_v52 = vld [vmem:[#allocation2 + $0x28] sm:$0x1]  ;;  %v800_v20 = vmax.f32 %v794_v33, 0.0  ;;  %v861_v59 = vld [vmem:[#allocation2 + $0x2a] sm:$0x1] }
 0x10b   : > { %v768_v28 = vsel %vm631_vm8, %v3066_v14, %v766_v27  ;;  %v704_v36 = vpack.c.b16 %v703_v18, %v703_v18  ;;  %v855_v23 = vmax.f32 %v843_v52, %v849_v42  ;;  %v910_v38 = vld [vmem:[#allocation2 + $0x2a] sm:$0x1]  ;;  %v636_v15 = vpack.c.b16 %v635_v24, %v635_v24  ;;  %v916_v51 = vld [vmem:[#allocation2 + $0x2b] sm:$0x1]  ;;  %v928_v47 = vld [vmem:[#allocation2 + $0x2c] sm:$0x1] }
 0x10c   : > { %v770_v50 = vsel %vm634_vm9, %v3068_v4, %v768_v28  ;;  %v3069_v6 = vmax.f32 %v2531_v35, 0.0  ;;  %v3070_v40 = vmax.f32 %v2541_v62, %v2543_v1  ;;  %v814_v56 = vpack.c.bf16 %v2599_v37, %v2599_v37 }
 0x10d   : > { %v771_v45 = vpack.c.b16 %v770_v50, %v770_v50  ;;  %v823_v9 = vunpack.c.l.b16 %v811_v61  ;;  %v867_v10 = vmax.f32 %v861_v59, 0.0  ;;  %v890_v48 = vunpack.c.l.b16 %v878_v11  ;;  %706 = vst.msk [vmem:[#allocation3 + $0x4] sm:$0x7] %vm638_vm10, %v704_v36 }
 0x10e   : > { %v943_v58 = vmax.f32 %v3070_v40, %v3069_v6  ;;  %v806_v44 = vmax.f32 %v788_v22, %v800_v20  ;;  %v922_v7 = vmax.f32 %v910_v38, %v916_v51  ;;  %v934_v3 = vmax.f32 %v928_v47, 0.0  ;;  %639 = vst.msk [vmem:[#allocation3] sm:$0x7] %vm638_vm10, %v636_v15 }
 0x10f   : > { %773 = vst.msk [vmem:[#allocation3 + $0x8] sm:$0x7] %vm638_vm10, %v771_v45  ;;  %v899_v12 = vrot.slane %v2584_v30, 5  ;;  %v881_v35 = vpack.c.bf16 %v875_v29, %v875_v29  ;;  %v957_v55 = vunpack.c.l.b16 %v945_v39  ;;  %v873_v46 = vmax.f32 %v855_v23, %v867_v10 }
 0x110   : > { %v3071_v62 = vpack.c.bf16 %v2539_v57, %v2539_v57  ;;  %v948_v37 = vpack.c.bf16 %v2632_v60, %v2632_v60  ;;  %v812_v19 = vpack.c.bf16 %v806_v44, %v806_v44  ;;  %v940_v54 = vmax.f32 %v922_v7, %v934_v3 }
 0x111   : > { %v3072_v8 = vpack.c.bf16 %v2545_v2, %v2545_v2  ;;  %v949_v34 = vpack.c.bf16 %v943_v58, %v943_v58  ;;  %v828_v63 = vrot.slane %v823_v9, 7  ;;  %v879_v29 = vpack.c.bf16 %v873_v46, %v873_v46 }
 0x112   : > { %v827_v1 = vunpack.c.l.b16 %v3071_v62  ;;  %v826_v31 = vunpack.c.l.b16 %v814_v56  ;;  %v895_v53 = vrot.slane %v890_v48, 7  ;;  %v824_v21 = vunpack.c.l.b16 %v812_v19 }
 0x113   : > { %v894_v30 = vunpack.c.l.b16 %v3072_v8  ;;  %v946_v43 = vpack.c.bf16 %v940_v54, %v940_v54  ;;  %v966_v57 = vrot.slane %v2586_v26, 5  ;;  %v893_v16 = vunpack.c.l.b16 %v881_v35 }
 0x114   : > { %v962_v61 = vrot.slane %v957_v55, 7  ;;  %v891_v60 = vunpack.c.l.b16 %v879_v29  ;;  %v836_v32 = vrot.slane %v827_v1, 3  ;;  %v960_v27 = vunpack.c.l.b16 %v948_v37  ;;  %v981_v26 = vld [vmem:[#allocation3 + $0x4] sm:$0xf] }
 0x115   : > { %v830_v0 = vrot.slane %v824_v21, 6  ;;  %v958_v17 = vunpack.c.l.b16 %v946_v43  ;;  %v903_v25 = vrot.slane %v894_v30, 3  ;;  %v961_v24 = vunpack.c.l.b16 %v949_v34  ;;  %987 = vrot.lane.b32.xlu2 %v981_v26, %s2220_s9  ;;  %v1272_v10 = vld [vmem:[#allocation3 + $0x4] sm:$0xe]  ;;  %v1038_v44 = vld [vmem:[#allocation3] sm:$0xf] }
 0x116   : > { %v829_v2 = vsel %vm622_vm4, %v828_v63, %v2572_v41  ;;  %v897_v11 = vrot.slane %v891_v60, 6  ;;  %v982_v14 = vld [vmem:[#allocation3 + $0x8] sm:$0xf]  ;;  %v834_v28 = vrot.slane %v826_v31, 4  ;;  %v896_v13 = vsel %vm622_vm4, %v895_v53, %v2574_v5  ;;  %v975_v7 = vld [vmem:[#allocation3] sm:$0xf] }
 0x117   : > { %v964_v18 = vrot.slane %v958_v17, 6  ;;  %989 = vrot.lane.b32.xlu0 %v982_v14, %s2220_s9  ;;  %v831_v39 = vsel %vm625_vm5, %v830_v0, %v829_v2  ;;  %v901_v22 = vrot.slane %v893_v16, 4  ;;  %v963_v33 = vsel %vm622_vm4, %v962_v61, %v2576_v49  ;;  %v3073_v41 = vld [vmem:[#allocation8_spill] sm:$0xff]  ;;  %978 = vst.msk [vmem:[#allocation4] sm:$0xf] %vm278_vm7, %v975_v7  ;;  %vm2723_vm4 = vmor %vm1042_vm14, %vm1043_vm15 }
 0x118   : > { %v3074_v52 = vrot.slane %v3073_v41, 5  ;;  %v898_v4 = vsel %vm625_vm5, %v897_v11, %v896_v13  ;;  %v968_v5 = vrot.slane %v960_v27, 4  ;;  %v970_v23 = vrot.slane %v961_v24, 3  ;;  %v1000_v9 = vld [vmem:[#allocation3 + $0x8] sm:$0xf] }
 0x119   : > { %v900_v36 = vsel %vm628_vm6, %v899_v12, %v898_v4  ;;  %v965_v20 = vsel %vm625_vm5, %v964_v18, %v963_v33  ;;  %v2704_v51 = vld [vmem:[#allocation3 + $0x8] sm:$0xf]  ;;  %v1975_v47 = vrot.slane %v1272_v10, 9  ;;  %v1362_v12 = vld [vmem:[#allocation3] sm:$0xe]  ;;  %v1046_v46 = vshrl.u32 %v1038_v44, 16  ;;  %vm2727_vm5 = vmor %vm1366_vm0, %vm1367_vm1 }
 0x11a   : > { %v833_v42 = vsel %vm628_vm6, %v3074_v52, %v831_v39  ;;  %v902_v49 = vsel %vm631_vm8, %v901_v22, %v900_v36  ;;  %v967_v38 = vsel %vm628_vm6, %v966_v57, %v965_v20  ;;  %v1282_v48 = vrot.slane %v2704_v51, 5  ;;  %v1363_v30 = vld [vmem:[#allocation3 + $0x4] sm:$0xf]  ;;  %v2734_v4 = vld [vmem:[#allocation3 + $0x8] sm:$0xf] }
 0x11b   : > { %v835_v50 = vsel %vm631_vm8, %v834_v28, %v833_v42  ;;  %v904_v15 = vsel %vm634_vm9, %v903_v25, %v902_v49  ;;  %v969_v6 = vsel %vm631_vm8, %v968_v5, %v967_v38  ;;  %v1049_v62 = vshll.u32 %v1038_v44, 16  ;;  %v1039_v29 = vld [vmem:[#allocation3 + $0x4] sm:$0xf]  ;;  %v1420_v42 = vld [vmem:[#allocation3 + $0x8] sm:$0xf] }
 0x11c   : > { %v837_v59 = vsel %vm634_vm9, %v836_v32, %v835_v50  ;;  %v905_v40 = vpack.c.b16 %v904_v15, %v904_v15  ;;  %v971_v58 = vsel %vm634_vm9, %v970_v23, %v969_v6  ;;  %v1283_v1 = vsel %vm2708_vm13, %v1975_v47, %v1282_v48  ;;  %v1364_v32 = vld [vmem:[#allocation3 + $0x8] sm:$0xf]  ;;  %v1419_v25 = vld [vmem:[#allocation3 + $0x4] sm:$0xe] }
 0x11d   : > { %v838_v45 = vpack.c.b16 %v837_v59, %v837_v59  ;;  %v972_v56 = vpack.c.b16 %v971_v58, %v971_v58  ;;  %v1370_v37 = vshrl.u32 %v1362_v12, 16  ;;  %v1373_v19 = vshll.u32 %v1362_v12, 16  ;;  %v1093_v7 = vld [vmem:[#allocation3 + $0x8] sm:$0xf] }
 0x11e   : > { %907 = vst.msk [vmem:[#allocation3 + $0x10] sm:$0x7] %vm638_vm10, %v905_v40  ;;  %v1048_v54 = vrot.slane %v1046_v46, 4  ;;  %v1051_v8 = vrot.slane %v1049_v62, 5  ;;  %v1379_v53 = vshrl.u32 %v1363_v30, 16  ;;  %v1382_v21 = vshll.u32 %v1363_v30, 16 }
 0x11f   : > { %840 = vst.msk [vmem:[#allocation3 + $0xc] sm:$0x7] %vm638_vm10, %v838_v45  ;;  %1006 = vrot.lane.b32.xlu0 %v1000_v9, %s2221_s13  ;;  %v1372_v34 = vrot.slane %v1370_v37, 5  ;;  %v1375_v63 = vrot.slane %v1373_v19, 6  ;;  %v1055_v61 = vshll.u32 %v1039_v29, 16  ;;  %v1059_v60 = vshrl.u32 %v1039_v29, 16 }
 0x120   : > { %974 = vst.msk [vmem:[#allocation3 + $0x14] sm:$0x7] %vm638_vm10, %v972_v56  ;;  %v1052_v57 = vor.u32 %v1051_v8, %v1048_v54  ;;  %v1381_v0 = vrot.slane %v1379_v53, 5  ;;  %v1384_v17 = vrot.slane %v1382_v21, 6  ;;  %v1389_v2 = vshrl.u32 %v1364_v32, 16 }
 0x121   : > { %v1376_v27 = vor.u32 %v1375_v63, %v1372_v34  ;;  %v1057_v14 = vrot.slane %v1055_v61, 5  ;;  %v1392_v28 = vshll.u32 %v1364_v32, 16  ;;  %v1061_v18 = vrot.slane %v1059_v60, 4  ;;  %v1092_v9 = vld [vmem:[#allocation3 + $0x4] sm:$0xf] }
 0x122   : > { %v1053_v24 = vrot.slane %v1052_v57, 4  ;;  %v1424_v39 = vshrl.u32 %v1419_v25, 16  ;;  %v1427_v22 = vshll.u32 %v1419_v25, 16  ;;  %v1385_v41 = vor.u32 %v1384_v17, %v1381_v0  ;;  %v976_v62 = vld [vmem:[#allocation3 + $0x4] sm:$0xf] }
 0x123   : > { %v1377_v13 = vrot.slane %v1376_v27, 4  ;;  %v1391_v5 = vrot.slane %v1389_v2, 5  ;;  %v1394_v50 = vrot.slane %v1392_v28, 6  ;;  %v1062_v59 = vor.u32 %v1061_v18, %v1057_v14  ;;  %v1143_v54 = vld [vmem:[#allocation3 + $0x8] sm:$0xf] }
 0x124   : > { %v1058_v52 = vsel %vm2723_vm4, %v1053_v24, %v1057_v14  ;;  %v1426_v49 = vrot.slane %v1424_v39, 5  ;;  %v1429_v38 = vrot.slane %v1427_v22, 6  ;;  %v1387_v45 = vrot.slane %v1385_v41, 4  ;;  %979 = vst.msk [vmem:[#allocation4 + $0x8] sm:$0xf] %vm278_vm7, %v976_v62 }
 0x125   : > { %v1020_v55 = vld [vmem:[#allocation3 + $0x10] sm:$0xf]  ;;  %v1386_v36 = vsel %vm2727_vm5, %v1377_v13, %v1385_v41  ;;  %v1065_v15 = vshll.u32 %v2734_v4, 16  ;;  %v1433_v58 = vshrl.u32 %v1420_v42, 16  ;;  %v1436_v56 = vshll.u32 %v1420_v42, 16 }
 0x126   : > { %v1001_v35 = vld [vmem:[#allocation3 + $0xc] sm:$0xf]  ;;  %1027 = vrot.lane.b32.xlu2 %v1020_v55, %s2222_s14  ;;  %v1002_v16 = vld [vmem:[#allocation3 + $0x10] sm:$0xf]  ;;  %v2741_v10 = vor.u32 %v1394_v50, %v1391_v5  ;;  %v1063_v47 = vrot.slane %v1062_v59, 4  ;;  %v1430_v44 = vor.u32 %v1429_v38, %v1426_v49  ;;  %v1097_v55 = vshrl.u32 %v1092_v9, 16 }
 0x127   : > { %1008 = vrot.lane.b32.xlu1 %v1001_v35, %s2221_s13  ;;  %1290 = vrot.lane.b32.xlu0 %v1283_v1, %s2220_s9  ;;  %v1019_v31 = vld [vmem:[#allocation3 + $0xc] sm:$0xf]  ;;  %v1021_v43 = vld [vmem:[#allocation3 + $0x14] sm:$0xf]  ;;  %v1333_v23 = vld [vmem:[#allocation3 + $0x10] sm:$0xf] }
 0x128   : > { %v983_v33 = vld [vmem:[#allocation3 + $0xc] sm:$0xf]  ;;  %v1342_v40 = vrot.slane %v1333_v23, 5  ;;  %v1396_v12 = vsel %vm2727_vm5, %v1387_v45, %v2741_v10  ;;  %v2746_v35 = vrot.slane %v1065_v15, 5  ;;  %v1100_v46 = vshll.u32 %v1092_v9, 16 }
 0x129   : > { %v1332_v20 = vld [vmem:[#allocation3 + $0xc] sm:$0xe]  ;;  %v1435_v37 = vrot.slane %v1433_v58, 5  ;;  %v1438_v19 = vrot.slane %v1436_v56, 6  ;;  %v2756_v30 = vld [vmem:[#allocation3 + $0x14] sm:$0xf] }
 0x12a   : > { %v1977_v6 = vrot.slane %v1332_v20, 9  ;;  %v1068_v8 = vsel %vm2723_vm4, %v1063_v47, %v2746_v35  ;;  %v1274_v34 = vld [vmem:[#allocation3 + $0xc] sm:$0xf]  ;;  %v1431_v63 = vrot.slane %v1430_v44, 4  ;;  %v1106_v29 = vshll.u32 %v1093_v7, 16 }
 0x12b   : > { %v977_v53 = vld [vmem:[#allocation3 + $0x8] sm:$0xf]  ;;  %v1099_v21 = vrot.slane %v1097_v55, 4  ;;  %v1148_v57 = vshrl.u32 %v1143_v54, 16  ;;  %v2760_v61 = vor.u32 %v1438_v19, %v1435_v37  ;;  %v1344_v60 = vrot.slane %v1342_v40, 4 }
 0x12c   : > { %v1343_v1 = vsel %vm2708_vm13, %v1977_v6, %v1342_v40  ;;  %980 = vst.msk [vmem:[#allocation4 + $0x10] sm:$0xf] %vm278_vm7, %v977_v53  ;;  %v1285_v32 = vrot.slane %v1274_v34, 5  ;;  %v2762_v27 = vld [vmem:[#allocation3 + $0xc] sm:$0xf]  ;;  %v1345_v25 = vrot.slane %v2756_v30, 5 }
 0x12d   : > { %v1474_v0 = vld [vmem:[#allocation3 + $0xc] sm:$0xf]  ;;  %v1440_v17 = vsel %vm2727_vm5, %v1431_v63, %v2760_v61  ;;  %v1108_v24 = vrot.slane %v1106_v29, 5  ;;  %v1284_v13 = vrot.slane %v1282_v48, 4  ;;  %v1150_v18 = vrot.slane %v1148_v57, 4 }
 0x12e   : > { %1029 = vrot.lane.b32.xlu2 %v1021_v43, %s2222_s14  ;;  %v1102_v43 = vrot.slane %v1100_v46, 5  ;;  %v2768_v14 = vld [vmem:[#allocation3 + $0xc] sm:$0xf]  ;;  %v1346_v22 = vsel %vm2708_vm13, %v1344_v60, %v1345_v25  ;;  %v1487_v41 = vshrl.u32 %v1474_v0, 16  ;;  %v1302_v56 = vld [vmem:[#allocation3 + $0x8] sm:$0xe] }
 0x12f   : > { %1025 = vrot.lane.b32.xlu1 %v1019_v31, %s2222_s14  ;;  %1010 = vrot.lane.b32.xlu0 %v1002_v16, %s2221_s13  ;;  %v1110_v31 = vshrl.u32 %v1093_v7, 16  ;;  %v1151_v16 = vshll.u32 %v1143_v54, 16  ;;  %v1286_v51 = vsel %vm2708_vm13, %v1284_v13, %v1285_v32  ;;  %v1157_v48 = vshll.u32 %v2768_v14, 16  ;;  %v1527_v38 = vld [vmem:[#allocation3 + $0xc] sm:$0xe] }
 0x130   : > { %v1103_v28 = vor.u32 %v1102_v43, %v1099_v21  ;;  %v1489_v23 = vrot.slane %v1487_v41, 5  ;;  %v1303_v15 = vld [vmem:[#allocation3 + $0xc] sm:$0xf]  ;;  %v1275_v7 = vld [vmem:[#allocation3 + $0x10] sm:$0x1]  ;;  %v1532_v55 = vshrl.u32 %v1527_v38, 16 }
 0x131   : > { %v1112_v2 = vrot.slane %v1110_v31, 4  ;;  %v1153_v39 = vrot.slane %v1151_v16, 5  ;;  %v2785_v49 = vrot.slane %v1157_v48, 5  ;;  %v1421_v47 = vld [vmem:[#allocation3 + $0xc] sm:$0xf]  ;;  %v1535_v46 = vshll.u32 %v1527_v38, 16 }
 0x132   : > { %v1104_v5 = vrot.slane %v1103_v28, 4  ;;  %v1312_v62 = vrot.slane %v1303_v15, 5  ;;  %v1287_v37 = vrot.slane %v1285_v32, 4  ;;  %v1976_v19 = vrot.slane %v1302_v56, 9  ;;  %v1528_v63 = vld [vmem:[#allocation3 + $0x10] sm:$0xf] }
 0x133   : > { %v1113_v42 = vor.u32 %v1112_v2, %v1108_v24  ;;  %v1154_v50 = vor.u32 %v1153_v39, %v1150_v18  ;;  %v1443_v34 = vshrl.u32 %v1421_v47, 16  ;;  %v1288_v29 = vrot.slane %v1275_v7, 5  ;;  %v1245_v53 = vld [vmem:[#allocation3] sm:$0xe]  ;;  %v1246_v21 = vld [vmem:[#allocation3 + $0x4] sm:$0xf] }
 0x134   : > { %v1109_v58 = vsel %vm2723_vm4, %v1104_v5, %v1108_v24  ;;  %v1446_v31 = vshll.u32 %v1421_v47, 16  ;;  %v1534_v57 = vrot.slane %v1532_v55, 5  ;;  %v1537_v16 = vrot.slane %v1535_v46, 6  ;;  %v1247_v60 = vld [vmem:[#allocation3 + $0x8] sm:$0xf] }
 0x135   : > { %v1114_v45 = vrot.slane %v1113_v42, 4  ;;  %v1155_v9 = vrot.slane %v1154_v50, 4  ;;  %v1313_v32 = vsel %vm2708_vm13, %v1976_v19, %v1312_v62  ;;  %v1445_v2 = vrot.slane %v1443_v34, 5  ;;  %v1195_v28 = vld [vmem:[#allocation3 + $0x10] sm:$0xf] }
 0x136   : > { %1079 = vrot.lane.b32.xlu2 %v1058_v52, %s2223_s15  ;;  %v1490_v52 = vshll.u32 %v1474_v0, 16  ;;  %v1289_v0 = vsel %vm2708_vm13, %v1287_v37, %v1288_v29  ;;  %v1974_v13 = vrot.slane %v1245_v53, 9  ;;  %v1258_v18 = vrot.slane %v1246_v21, 5  ;;  %v1473_v41 = vld [vmem:[#allocation3 + $0x8] sm:$0xe] }
 0x137   : > { %991 = vrot.lane.b32.xlu1 %v983_v33, %s2220_s9  ;;  %1407 = vrot.lane.b32.xlu0 %v1386_v36, %s2223_s15  ;;  %v1116_v33 = vshll.u32 %v2762_v27, 16  ;;  %v1475_v36 = vld [vmem:[#allocation3 + $0x10] sm:$0xf]  ;;  %v1448_v39 = vrot.slane %v1446_v31, 6  ;;  %v1538_v48 = vor.u32 %v1537_v16, %v1534_v57  ;;  %v1208_v50 = vshll.u32 %v1195_v28, 16 }
 0x138   : > { %v1492_v59 = vrot.slane %v1490_v52, 6  ;;  %v1497_v6 = vshrl.u32 %v1475_v36, 16  ;;  %v1500_v40 = vshll.u32 %v1475_v36, 16  ;;  %v1261_v52 = vrot.slane %v1247_v60, 5  ;;  %v1304_v38 = vld [vmem:[#allocation3 + $0x10] sm:$0xf] }
 0x139   : > { %v2783_v20 = vrot.slane %v1116_v33, 5  ;;  %v1544_v33 = vshll.u32 %v1528_v63, 16  ;;  %v1259_v42 = vsel %vm2708_vm13, %v1974_v13, %v1258_v18  ;;  %v1212_v36 = vshrl.u32 %v1195_v28, 16  ;;  %v1305_v21 = vld [vmem:[#allocation3 + $0x14] sm:$0x1] }
 0x13a   : > { %v1499_v54 = vrot.slane %v1497_v6, 5  ;;  %1269 = vst.msk [vmem:[#allocation4 + $0x4] sm:$0xf] %vm278_vm7, %v1259_v42  ;;  %v1478_v15 = vshrl.u32 %v1473_v41, 16  ;;  %v1481_v6 = vshll.u32 %v1473_v41, 16  ;;  %v2820_v47 = vor.u32 %v1448_v39, %v1445_v2 }
 0x13b   : > { %v1119_v44 = vsel %vm2723_vm4, %v1114_v45, %v2783_v20  ;;  %v1314_v45 = vrot.slane %v1312_v62, 4  ;;  %v1315_v7 = vrot.slane %v1304_v38, 5  ;;  %v1539_v55 = vrot.slane %v1538_v48, 4  ;;  %v1529_v57 = vld [vmem:[#allocation3 + $0x14] sm:$0xf] }
 0x13c   : > { %v2823_v46 = vrot.slane %v1208_v50, 5  ;;  %v1214_v62 = vrot.slane %v1212_v36, 4  ;;  %v1480_v37 = vrot.slane %v1478_v15, 5  ;;  %v1483_v19 = vrot.slane %v1481_v6, 6  ;;  %v1335_v50 = vld [vmem:[#allocation3 + $0x18] sm:$0x1] }
 0x13d   : > { %v1317_v16 = vrot.slane %v1315_v7, 4  ;;  %v1551_v2 = vshrl.u32 %v1529_v57, 16  ;;  %v1554_v28 = vshll.u32 %v1529_v57, 16  ;;  %v1161_v39 = vshrl.u32 %v2768_v14, 16  ;;  %v1145_v38 = vld [vmem:[#allocation3 + $0x10] sm:$0xf] }
 0x13e   : > { %1350 = vrot.lane.b32.xlu2 %v1343_v1, %s2222_s14  ;;  %v1160_v1 = vsel %vm2723_vm4, %v1155_v9, %v2785_v49  ;;  %v1215_v53 = vor.u32 %v1214_v62, %v2823_v46  ;;  %v1348_v6 = vrot.slane %v1335_v50, 5  ;;  %v1095_v30 = vld [vmem:[#allocation3 + $0x10] sm:$0x1]  ;;  %vm996_vm6 = vcmask 257152  }
 0x13f   : > { %1409 = vrot.lane.b32.xlu1 %v1396_v12, %s2223_s15  ;;  %1081 = vrot.lane.b32.xlu0 %v1068_v8, %s2223_s15  ;;  %v2793_v12 = vor.u32 %v1492_v59, %v1489_v23  ;;  %v1502_v8 = vrot.slane %v1500_v40, 6  ;;  %v1263_v23 = vrot.slane %v1261_v52, 4  ;;  %v1260_v59 = vrot.slane %v1258_v18, 4 }
 0x140   : > { %v1216_v13 = vrot.slane %v1215_v53, 4  ;;  %v1553_v48 = vrot.slane %v1551_v2, 5  ;;  %v1556_v42 = vrot.slane %v1554_v28, 6  ;;  %v1397_v53 = vrot.slane %v2741_v10, 4  ;;  %v1422_v28 = vld [vmem:[#allocation3 + $0x10] sm:$0x3] }
 0x141   : > { %v1495_v43 = vrot.slane %v2793_v12, 4  ;;  %v2805_v24 = vor.u32 %v1502_v8, %v1499_v54  ;;  %v1262_v9 = vsel %vm2708_vm13, %v1260_v59, %v1261_v52  ;;  %v1316_v54 = vsel %vm2708_vm13, %v1314_v45, %v1315_v7 }
 0x142   : > { %1270 = vst.msk [vmem:[#allocation4 + $0xc] sm:$0xf] %vm278_vm7, %v1262_v9  ;;  %v2856_v15 = vor.u32 %v1556_v42, %v1553_v48  ;;  %v1167_v9 = vshll.u32 %v1145_v38, 16  ;;  %v1171_v7 = vshrl.u32 %v1145_v38, 16  ;;  %v1453_v48 = vshrl.u32 %v1422_v28, 16 }
 0x143   : > { %v1456_v42 = vshll.u32 %v1422_v28, 16  ;;  %vm1034_vm8 = vcmask 519552   ;;  %vm1088_vm9 = vcmask 650752   ;;  %vm1139_vm10 = vcmask 781952  }
 0x146   : > { %1352 = vrot.lane.b32.xlu2 %v1346_v22, %s2222_s14  ;;  %v1541_v22 = vshrl.u32 %v1528_v63, 16  ;;  %v2833_v63 = vld [vmem:[#allocation3 + $0x14] sm:$0xf] }
 0x147   : > { %1461 = vrot.lane.b32.xlu1 %v1440_v17, %s2224_s16  ;;  %1292 = vrot.lane.b32.xlu0 %v1286_v51, %s2220_s9  ;;  %v1248_v17 = vld [vmem:[#allocation3 + $0xc] sm:$0x1]  ;;  %v1504_v51 = vsel %vm2727_vm5, %v1495_v43, %v2805_v24  ;;  %v1484_v43 = vor.u32 %v1483_v19, %v1480_v37  ;;  %v1218_v60 = vshll.u32 %v2833_v63, 16 }
 0x148   : > { %v1264_v5 = vrot.slane %v1248_v17, 5  ;;  %v1543_v40 = vrot.slane %v1541_v22, 5  ;;  %v1318_v17 = vrot.slane %v1305_v21, 5  ;;  %v1041_v19 = vld [vmem:[#allocation3 + $0xc] sm:$0x1] }
 0x149   : > { %v1485_v18 = vrot.slane %v1484_v43, 4  ;;  %v1075_v3 = vshll.u32 %v1041_v19, 16  ;;  %v1146_v43 = vld [vmem:[#allocation3 + $0x14] sm:$0x1]  ;;  %v2084_v19 = vld [vmem:[%s3049_s3 + $0x38] sm:$0xff] }
 0x14a   : > { %v1265_v56 = vsel %vm2708_vm13, %v1263_v23, %v1264_v5  ;;  %v1319_v22 = vsel %vm2708_vm13, %v1317_v16, %v1318_v17  ;;  %v1365_v5 = vld [vmem:[#allocation3 + $0xc] sm:$0x3]  ;;  %v1163_v23 = vrot.slane %v1161_v39, 4  ;;  %v1530_v17 = vld [vmem:[#allocation3 + $0x18] sm:$0x3]  ;;  %v1177_v2 = vshll.u32 %v1146_v43, 16  ;;  %1733 = vmatpush.bf16.msrb.mxu1 %v2084_v19 }
 0x14b   : > { %1271 = vst.msk [vmem:[#allocation4 + $0x14] sm:$0xf] %vm278_vm7, %v1265_v56  ;;  %v1494_v41 = vsel %vm2727_vm5, %v1485_v18, %v2793_v12  ;;  %v1399_v12 = vshrl.u32 %v1365_v5, 16  ;;  %v1402_v45 = vshll.u32 %v1365_v5, 16  ;;  %v1222_v5 = vshrl.u32 %v2833_v63, 16 }
 0x14c   : > { %v1164_v56 = vor.u32 %v1163_v23, %v2785_v49  ;;  %vm1015_vm7 = vcmask 388352  }
 0x14d   : > { %v1404_v62 = vrot.slane %v1402_v45, 6  ;;  %v1458_v45 = vrot.slane %v1456_v42, 6  ;;  %v2078_v42 = vld [vmem:[%s3049_s3 + $0x8] sm:$0xff] }
 0x14e   : > { %1132 = vrot.lane.b32.xlu2 %v1119_v44, %s2224_s16  ;;  %v1194_v44 = vld [vmem:[#allocation3 + $0xc] sm:$0xf]  ;;  %v1165_v37 = vrot.slane %v1164_v56, 4  ;;  %v1197_v56 = vld [vmem:[#allocation3 + $0x18] sm:$0x1] }
 0x14f   : > { %1130 = vrot.lane.b32.xlu1 %v1109_v58, %s2224_s16  ;;  %1181 = vrot.lane.b32.xlu0 %v1160_v1, %s2225_s17  ;;  %v1546_v58 = vrot.slane %v1544_v33, 6  ;;  %v1441_v1 = vrot.slane %v2760_v61, 4  ;;  %v1199_v29 = vshrl.u32 %v1194_v44, 16  ;;  %v1202_v31 = vshll.u32 %v1194_v44, 16 }
 0x150   : > { %v2844_v33 = vrot.slane %v1218_v60, 5 }
 0x151   : > { %v1547_v8 = vor.u32 %v1546_v58, %v1543_v40  ;;  %v1450_v34 = vsel %vm2727_vm5, %v1441_v1, %v2820_v47 }
 0x152   : > { %v1221_v14 = vsel %vm2723_vm4, %v1216_v13, %v2844_v33  ;;  %v1077_v13 = vrot.slane %v1075_v3, 5 }
 0x153   : > { %v1548_v61 = vsel %vm2727_vm5, %v1539_v55, %v1547_v8  ;;  %v1549_v36 = vrot.slane %v1547_v8, 4  ;;  %v1401_v55 = vrot.slane %v1399_v12, 5  ;;  %v1455_v12 = vrot.slane %v1453_v48, 5 }
 0x155   : > { %v1558_v58 = vsel %vm2727_vm5, %v1549_v36, %v2856_v15  ;;  %v1405_v8 = vor.u32 %v1404_v62, %v1401_v55  ;;  %v1228_v55 = vshll.u32 %v1197_v56, 16 }
 0x156   : > { %1294 = vrot.lane.b32.xlu2 %v1289_v0, %s2220_s9  ;;  %v1204_v0 = vrot.slane %v1202_v31, 5  ;;  %s1828_s9 = sshll.u32 %s1825_s29, 4  ;;  %s1829_s9 = int_to_ptr.hbm [resolvable:$true] %s1828_s9 }
 0x157   : > { %1320 = vrot.lane.b32.xlu1 %v1313_v32, %s2221_s13  ;;  %1517 = vrot.lane.b32.xlu0 %v1504_v51, %s2225_s17  ;;  %v1201_v32 = vrot.slane %v1199_v29, 4  ;;  %v1120_v51 = vshrl.u32 %v2762_v27, 16  ;;  %v1347_v27 = vrot.slane %v1345_v25, 4  ;;  %v1069_v25 = vshrl.u32 %v2734_v4, 16  ;;  %v1476_v29 = vld [vmem:[#allocation3 + $0x14] sm:$0x3] }
 0x158   : > { %v1507_v57 = vshrl.u32 %v1476_v29, 16  ;;  %v1510_v16 = vshll.u32 %v1476_v29, 16  ;;  %v1406_v60 = vsel %vm2727_vm5, %v1397_v53, %v1405_v8  ;;  %v2083_v8 = vld [vmem:[%s3049_s3 + $0x30] sm:$0xff]  ;;  %v2092_v53 = vld [vmem:[%s3049_s3 + $0x78] sm:$0xff] }
 0x159   : > { %v1205_v52 = vor.u32 %v1204_v0, %v1201_v32  ;;  %v1122_v40 = vrot.slane %v1120_v51, 4  ;;  %v1349_v1 = vsel %vm2708_vm13, %v1347_v27, %v1348_v6  ;;  %v1451_v27 = vrot.slane %v2820_v47, 4  ;;  %1734 = vmatpush.bf16.msrb.mxu1 %v2083_v8  ;;  %1751 = vmatpush.bf16.msra.mxu2 %v2092_v53 }
 0x15a   : > { %v1509_v18 = vrot.slane %v1507_v57, 5  ;;  %v1512_v39 = vrot.slane %v1510_v16, 6  ;;  %v1224_v6 = vrot.slane %v1222_v5, 4  ;;  %v2081_v57 = vld [vmem:[%s3049_s3 + $0x20] sm:$0xff]  ;;  %v2090_v16 = vld [vmem:[%s3049_s3 + $0x68] sm:$0xff] }
 0x15b   : > { %v1206_v59 = vrot.slane %v1205_v52, 4  ;;  %v1123_v49 = vor.u32 %v1122_v40, %v2783_v20  ;;  %v1564_v52 = vshll.u32 %v1530_v17, 16  ;;  %v1559_v40 = vrot.slane %v2856_v15, 4 }
 0x15c   : > { %v1513_v36 = vor.u32 %v1512_v39, %v1509_v18  ;;  %v2079_v39 = vld [vmem:[%s3049_s3 + $0x10] sm:$0xff] }
 0x15d   : > { %v1211_v44 = vsel %vm2723_vm4, %v1206_v59, %v2823_v46  ;;  %v1169_v46 = vrot.slane %v1167_v9, 5  ;;  %v1124_v4 = vrot.slane %v1123_v49, 4  ;;  %v1566_v38 = vrot.slane %v1564_v52, 6 }
 0x15e   : > { %1463 = vrot.lane.b32.xlu2 %v1450_v34, %s2224_s16  ;;  %v1173_v34 = vrot.slane %v1171_v7, 4  ;;  %v1459_v9 = vor.u32 %v1458_v45, %v1455_v12  ;;  %v1225_v7 = vor.u32 %v1224_v6, %v2844_v33 }
 0x15f   : > { %1322 = vrot.lane.b32.xlu1 %v1316_v54, %s2221_s13  ;;  %1569 = vrot.lane.b32.xlu0 %v1548_v61, %s2226_s18  ;;  %v1126_v54 = vshll.u32 %v1095_v30, 16  ;;  %v1071_v61 = vrot.slane %v1069_v25, 4  ;;  %v1170_v20 = vsel %vm2723_vm4, %v1165_v37, %v1169_v46  ;;  %v1230_v25 = vrot.slane %v1228_v55, 5 }
 0x160   : > { %v1174_v32 = vor.u32 %v1173_v34, %v1169_v46  ;;  %v1226_v30 = vrot.slane %v1225_v7, 4 }
 0x161   : > { %v1128_v21 = vrot.slane %v1126_v54, 5  ;;  %v1072_v10 = vor.u32 %v1071_v61, %v2746_v35  ;;  %v1179_v35 = vrot.slane %v1177_v2, 5  ;;  %v2088_v2 = vld [vmem:[%s3049_s3 + $0x58] sm:$0xff] }
 0x163   : > { %v1129_v0 = vsel %vm2723_vm4, %v1124_v4, %v1128_v21  ;;  %v1073_v51 = vrot.slane %v1072_v10, 4  ;;  %v2082_v4 = vld [vmem:[%s3049_s3 + $0x28] sm:$0xff] }
 0x164   : > { %1735 = vmatpush.bf16.msrb.mxu1 %v2082_v4 }
 0x165   : > { %v1078_v50 = vsel %vm2723_vm4, %v1073_v51, %v1077_v13  ;;  %v2087_v13 = vld [vmem:[%s3049_s3 + $0x50] sm:$0xff]  ;;  %v2085_v51 = vld [vmem:[%s3049_s3 + $0x40] sm:$0xff] }
 0x166   : > { %1515 = vrot.lane.b32.xlu2 %v1494_v41, %s2225_s17  ;;  %v1561_v41 = vshrl.u32 %v1530_v17, 16 }
 0x167   : > { %1324 = vrot.lane.b32.xlu1 %v1319_v22, %s2221_s13  ;;  %1234 = vrot.lane.b32.xlu0 %v1221_v14, %s2226_s18  ;;  %v1175_v22 = vrot.slane %v1174_v32, 4  ;;  %v1505_v14 = vrot.slane %v2805_v24, 4  ;;  %v2089_v32 = vld [vmem:[%s3049_s3 + $0x60] sm:$0xff] }
 0x168   : > { %v1563_v59 = vrot.slane %v1561_v41, 5  ;;  %1736 = vmatpush.bf16.msrb.mxu1 %v2081_v57  ;;  %v2086_v41 = vld [vmem:[%s3049_s3 + $0x48] sm:$0xff] }
 0x169   : > { %v1180_v23 = vsel %vm2723_vm4, %v1175_v22, %v1179_v35  ;;  %v1514_v24 = vsel %vm2727_vm5, %v1505_v14, %v1513_v36 }
 0x16e   : > { %1232 = vrot.lane.b32.xlu2 %v1211_v44, %s2226_s18  ;;  %v1460_v44 = vsel %vm2727_vm5, %v1451_v27, %v1459_v9 }
 0x16f   : > { %1571 = vrot.lane.b32.xlu1 %v1558_v58, %s2226_s18  ;;  %1354 = vrot.lane.b32.xlu0 %v1349_v1, %s2222_s14  ;;  %v988_v31 = vpop.permute.xlu2 %987  ;;  %v1567_v58 = vor.u32 %v1566_v38, %v1563_v59  ;;  %v1231_v1 = vsel %vm2723_vm4, %v1226_v30, %v1230_v25  ;;  %s2168_s14 = sshra.s32 %s1829_s9, 4  ;;  %s2169_s14 = int_to_ptr.hbm [resolvable:$true] %s2168_s14 }
 0x170   : > { %997 = vst.msk [vmem:[#allocation4] sm:$0xf] %vm996_vm6, %v988_v31  ;;  %p2175_p0 = scmp.lt.s32.totalorder %s2169_s14, %s3053_s7 }
 0x171   : > { %v1568_v62 = vsel %vm2727_vm5, %v1559_v40, %v1567_v58  ;;  %v2093_v40 = vld [vmem:[%s3051_s5] sm:$0xff] }
 0x172   : > { %1799 = vmatpush.bf16.msrb.mxu3 %v2093_v40 }
 0x176   : > { %1411 = vrot.lane.b32.xlu2 %v1406_v60, %s2223_s15 }
 0x177   : > { %1183 = vrot.lane.b32.xlu1 %v1170_v20, %s2225_s17  ;;  %1134 = vrot.lane.b32.xlu0 %v1129_v0, %s2224_s16  ;;  %v2091_v20 = vld [vmem:[%s3049_s3 + $0x70] sm:$0xff]  ;;  %v2080_v0 = vld [vmem:[%s3049_s3 + $0x18] sm:$0xff] }
 0x178   : > { %1752 = vmatpush.bf16.msra.mxu2 %v2091_v20  ;;  %1737 = vmatpush.bf16.msrb.mxu1 %v2080_v0 }
 0x17c   : > { %1753 = vmatpush.bf16.msra.mxu2 %v2090_v16  ;;  %1738 = vmatpush.bf16.msrb.mxu1 %v2079_v39 }
 0x17e   : > { %1185 = vrot.lane.b32.xlu2 %v1180_v23, %s2225_s17 }
 0x17f   : > { %1083 = vrot.lane.b32.xlu1 %v1078_v50, %s2223_s15  ;;  %1519 = vrot.lane.b32.xlu0 %v1514_v24, %s2225_s17  ;;  %v2077_v50 = vld [vmem:[%s3049_s3] sm:$0xff]  ;;  %s2170_s15 = scalar_lea.hbm %s2169_s14, 24  ;;  %s2174_s17 = scalar_lea.hbm %s3053_s7, 48 }
 0x180   : > { %v1028_v63 = vpop.permute.xlu2 %1027  ;;  %1754 = vmatpush.bf16.msra.mxu2 %v2089_v32  ;;  %1739 = vmatpush.bf16.msrb.mxu1 %v2078_v42  ;;  %p2171_p11 = scmp.ne.s32.totalorder %s2169_s14, %s2170_s15  ;;  %p2176_p1 = scmp.lt.s32.totalorder %s2174_s17, %s2170_s15 }
 0x182   : > { %p2172_p12 = pnand %p2171_p11, %p2307_p5  ;;  %p2177_p2 = por %p2176_p1, %p2175_p0 }
 0x184   : > { %1755 = vmatpush.bf16.msra.mxu2 %v2088_v2  ;;  %1740 = vmatpush.bf16.msrb.mxu1 %v2077_v50  ;;  %p2173_p13 = pneg %p2172_p12 }
 0x186   : > { %1573 = vrot.lane.b32.xlu2 %v1568_v62, %s2226_s18  ;;  %p2178_p3 = pnand %p2177_p2, %p2173_p13 }
 0x187   : > { %1465 = vrot.lane.b32.xlu1 %v1460_v44, %s2224_s16 }
 0x188   : > { %v1030_v47 = vpop.permute.xlu2 %1029  ;;  %1756 = vmatpush.bf16.msra.mxu2 %v2087_v13 }
 0x189   : > { %v990_v15 = vpop.permute.xlu0 %989 }
 0x18a   : > { %998 = vst.msk [vmem:[#allocation4 + $0x8] sm:$0xf] %vm996_vm6, %v990_v15 }
 0x18c   : > { %1757 = vmatpush.bf16.msra.mxu2 %v2086_v41 }
 0x18f   : > { %1236 = vrot.lane.b32.xlu1 %v1231_v1, %s2226_s18 }
 0x190   : > { %v1080_v33 = vpop.permute.xlu2 %1079  ;;  %1758 = vmatpush.bf16.msra.mxu2 %v2085_v51 }
 0x191   : > { %v1007_v49 = vpop.permute.xlu0 %1006 }
 0x192   : > { %1016 = vst.msk [vmem:[#allocation4] sm:$0xf] %vm1015_vm7, %v1007_v49 }
 0x198   : > { %v1351_v37 = vpop.permute.xlu2 %1350 }
 0x199   : > { %v1009_v26 = vpop.permute.xlu1 %1008  ;;  %v1291_v11 = vpop.permute.xlu0 %1290 }
 0x19a   : > { %1017 = vst.msk [vmem:[#allocation4 + $0x8] sm:$0xf] %vm1015_vm7, %v1009_v26  ;;  %v2072_v26 = vld [vmem:[%s2331_s23 + $0x68] sm:$0xff]  ;;  %s269_s23 = sand.u32 1, %s2208_s25  }
 0x19b   : > { %1036 = vst.msk [vmem:[#allocation4 + $0x8] sm:$0xf] %vm1034_vm8, %v1028_v63  ;;  %1973 = vmatmul.msk.bf16.gmra.mxu3 %vm403_vm2, %v2072_v26  ;;  %s2098_s16 = smul.u32 24, %s269_s23  ;;  %s1814_s13 = scalar_lea.sflag [#allocation6], %s269_s23 }
 0x19c   : > { %1299 = vst.msk [vmem:[#allocation4 + $0x4] sm:$0xf] %vm996_vm6, %v1291_v11  ;;  %v2152_v11 = vld [vmem:[%s3050_s4] ss:$0 sm:$0xff] }
 0x19d   : > { %s271_s19 = scalar_lea.vmem [#allocation5], %s2098_s16 }
 0x19e   : > { %s1826_s8 = sshll.u32 %s271_s19, 4  ;;  %s1827_s8 = int_to_ptr.vmem [resolvable:$true] %s1826_s8 }
 0x1a0   : > { %v2918_v46 = vpop.permute.xlu2 %1352 }
 0x1a1   : > { %v1026_v54 = vpop.permute.xlu1 %1025  ;;  %v1011_v34 = vpop.permute.xlu0 %1010 }
 0x1a2   : > { %1035 = vst.msk [vmem:[#allocation4] sm:$0xf] %vm1034_vm8, %v1026_v54 }
 0x1a3   : > { %1089 = vst.msk [vmem:[#allocation4] sm:$0xf] %vm1088_vm9, %v1080_v33 }
 0x1a8   : > { %v1133_v31 = vpop.permute.xlu2 %1132 }
 0x1a9   : > { %v992_v29 = vpop.permute.xlu1 %991  ;;  %v1408_v61 = vpop.permute.xlu0 %1407 }
 0x1aa   : > { %999 = vst.msk [vmem:[#allocation4 + $0x10] sm:$0xf] %vm996_vm6, %v992_v29 }
 0x1ab   : > { %1018 = vst.msk [vmem:[#allocation4 + $0x10] sm:$0xf] %vm1015_vm7, %v1011_v34 }
 0x1ac   : > { %1037 = vst.msk [vmem:[#allocation4 + $0x10] sm:$0xf] %vm1034_vm8, %v1030_v47 }
 0x1b0   : > { %v1295_v21 = vpop.permute.xlu2 %1294 }
 0x1b1   : > { %v1410_v3 = vpop.permute.xlu1 %1409  ;;  %1301 = vst.msk [vmem:[#allocation4 + $0x14] sm:$0xf] %vm996_vm6, %v1295_v21  ;;  %v1082_v43 = vpop.permute.xlu0 %1081 }
 0x1b2   : > { %1090 = vst.msk [vmem:[#allocation4 + $0x8] sm:$0xf] %vm1088_vm9, %v1082_v43 }
 0x1b3   : > { %1141 = vst.msk [vmem:[#allocation4 + $0x8] sm:$0xf] %vm1139_vm10, %v1133_v31 }
 0x1b8   : > { %v1464_v10 = vpop.permute.xlu2 %1463 }
 0x1b9   : > { %v1462_v60 = vpop.permute.xlu1 %1461  ;;  %v1293_v17 = vpop.permute.xlu0 %1292 }
 0x1ba   : > { %1300 = vst.msk [vmem:[#allocation4 + $0xc] sm:$0xf] %vm996_vm6, %v1293_v17  ;;  %v2153_v17 = vld [vmem:[%s3052_s6] ss:$0 sm:$0xff] }
 0x1c0   : > { %v1516_v18 = vpop.permute.xlu2 %1515 }
 0x1c1   : > { %v1131_v28 = vpop.permute.xlu1 %1130  ;;  %v1182_v22 = vpop.permute.xlu0 %1181 }
 0x1c2   : > { %1140 = vst.msk [vmem:[#allocation4] sm:$0xf] %vm1139_vm10, %v1131_v28 }
 0x1c3   : > { %1191 = vst.msk [vmem:[#allocation4] sm:$0xf] %vm1190_vm11, %v1182_v22 }
 0x1c8   : > { %v1233_v14 = vpop.permute.xlu2 %1232 }
 0x1c9   : > { %v1321_v52 = vpop.permute.xlu1 %1320  ;;  %v1518_v48 = vpop.permute.xlu0 %1517  ;;  %1242 = vst.msk [vmem:[#allocation4] sm:$0xf] %vm1241_vm12, %v1233_v14 }
 0x1ca   : > { %1329 = vst.msk [vmem:[#allocation4 + $0x4] sm:$0xf] %vm1015_vm7, %v1321_v52 }
 0x1cb   : > { %1359 = vst.msk [vmem:[#allocation4 + $0x4] sm:$0xf] %vm1034_vm8, %v1351_v37 }
 0x1cc   : > { %1416 = vst.msk [vmem:[#allocation4 + $0x4] sm:$0xf] %vm1088_vm9, %v1408_v61 }
 0x1cd   : > { %1470 = vst.msk [vmem:[#allocation4 + $0x4] sm:$0xf] %vm1139_vm10, %v1462_v60 }
 0x1ce   : > { %1524 = vst.msk [vmem:[#allocation4 + $0x4] sm:$0xf] %vm1190_vm11, %v1516_v18 }
 0x1d0   : > { %v1412_v12 = vpop.permute.xlu2 %1411  ;;  %v1980_v9 = vld [vmem:[#allocation4] sm:$0xf] }
 0x1d1   : > { %v1323_v35 = vpop.permute.xlu1 %1322  ;;  %v1570_v5 = vpop.permute.xlu0 %1569 }
 0x1d2   : > { %1330 = vst.msk [vmem:[#allocation4 + $0xc] sm:$0xf] %vm1015_vm7, %v1323_v35 }
 0x1d3   : > { %1360 = vst.msk [vmem:[#allocation4 + $0xc] sm:$0xf] %vm1034_vm8, %v2918_v46 }
 0x1d4   : > { %1417 = vst.msk [vmem:[#allocation4 + $0xc] sm:$0xf] %vm1088_vm9, %v1410_v3 }
 0x1d5   : > { %1471 = vst.msk [vmem:[#allocation4 + $0xc] sm:$0xf] %vm1139_vm10, %v1464_v10 }
 0x1d6   : > { %1525 = vst.msk [vmem:[#allocation4 + $0xc] sm:$0xf] %vm1190_vm11, %v1518_v48 }
 0x1d7   : > { %1578 = vst.msk [vmem:[#allocation4 + $0x4] sm:$0xf] %vm1241_vm12, %v1570_v5 }
 0x1d8   : > { %v1186_v58 = vpop.permute.xlu2 %1185 }
 0x1d9   : > { %v1325_v36 = vpop.permute.xlu1 %1324  ;;  %v1235_v23 = vpop.permute.xlu0 %1234 }
 0x1da   : > { %1331 = vst.msk [vmem:[#allocation4 + $0x14] sm:$0xf] %vm1015_vm7, %v1325_v36 }
 0x1de   : > { %v2075_v24 = vld [vmem:[#allocation4 + $0x4] sm:$0xf] }
 0x1e0   : > { %v1574_v47 = vpop.permute.xlu2 %1573 }
 0x1e1   : > { %v1572_v59 = vpop.permute.xlu1 %1571  ;;  %v1355_v38 = vpop.permute.xlu0 %1354 }
 0x1e2   : > { %1579 = vst.msk [vmem:[#allocation4 + $0xc] sm:$0xf] %vm1241_vm12, %v1572_v59 }
 0x1e3   : > { %1361 = vst.msk [vmem:[#allocation4 + $0x14] sm:$0xf] %vm1034_vm8, %v1355_v38 }
 0x1e4   : > { %1418 = vst.msk [vmem:[#allocation4 + $0x14] sm:$0xf] %vm1088_vm9, %v1412_v12 }
 0x1e9   : > { %v1184_v45 = vpop.permute.xlu1 %1183  ;;  %v1982_v63 = vld [vmem:[#allocation4 + $0x8] sm:$0xf0]  ;;  %v1135_v6 = vpop.permute.xlu0 %1134 }
 0x1ea   : > { %1192 = vst.msk [vmem:[#allocation4 + $0x8] sm:$0xf] %vm1190_vm11, %v1184_v45  ;;  %v1985_v27 = vor.u32 %v2075_v24, %v1982_v63 }
 0x1eb   : > { %1243 = vst.msk [vmem:[#allocation4 + $0x8] sm:$0xf] %vm1241_vm12, %v1235_v23 }
 0x1ec   : > { %1759 = vmatmul.bf16.vlgmr.msra.gmra.mxu2 %v1985_v27 }
 0x1f1   : > { %v1084_v56 = vpop.permute.xlu1 %1083  ;;  %v1520_v55 = vpop.permute.xlu0 %1519 }
 0x1f2   : > { %1091 = vst.msk [vmem:[#allocation4 + $0x10] sm:$0xf] %vm1088_vm9, %v1084_v56  ;;  %v2076_v44 = vld [vmem:[#allocation4 + $0x4] sm:$0xf0] }
 0x1f3   : > { %1142 = vst.msk [vmem:[#allocation4 + $0x10] sm:$0xf] %vm1139_vm10, %v1135_v6  ;;  %v1981_v7 = vor.u32 %v2076_v44, %v1980_v9 }
 0x1f4   : > { %1193 = vst.msk [vmem:[#allocation4 + $0x10] sm:$0xf] %vm1190_vm11, %v1186_v58 }
 0x1f5   : > { %1741 = vmatmul.bf16.vlgmr.msrb.gmra.mxu1 %v1981_v7 }
 0x1f9   : > { %v1466_v62 = vpop.permute.xlu1 %1465 }
 0x1fa   : > { %1472 = vst.msk [vmem:[#allocation4 + $0x14] sm:$0xf] %vm1139_vm10, %v1466_v62 }
 0x1fb   : > { %1526 = vst.msk [vmem:[#allocation4 + $0x14] sm:$0xf] %vm1190_vm11, %v1520_v55 }
 0x1fc   : > { %1580 = vst.msk [vmem:[#allocation4 + $0x14] sm:$0xf] %vm1241_vm12, %v1574_v47 }
 0x201   : > { %v1237_v30 = vpop.permute.xlu1 %1236 }
 0x202   : > { %1244 = vst.msk [vmem:[#allocation4 + $0x10] sm:$0xf] %vm1241_vm12, %v1237_v30 }
 0x209   : > { %v1583_v25 = vld [vmem:[#allocation4 + $0x10] sm:$0xff] }
 0x20a   : > { %v1627_v15 = vunpack.c.l.b16 %v1583_v25  ;;  %v1628_v1 = vunpack.c.h.b16 %v1583_v25 }
 0x20c   : > { %v1631_v33 = vpack.c.b16 %v1627_v15, %v1627_v15  ;;  %v1632_v49 = vpack.c.b16 %v1628_v1, %v1628_v1 }
 0x20e   : > { %1746 = vmatmul.bf16.gmra.mxu1 %v1631_v33  ;;  %1764 = vmatmul.bf16.gmra.mxu2 %v1632_v49 }
 0x21e   : > { %v527_v10 = vpop.f32.mrf.mxu3 }
 0x226   : > { %v528_v0 = vpop.f32.mrf.mxu3 }
 0x26f   : > { %v1760_v37 = vpop.f32.mrf.mxu2 }
 0x272   : > { %v1742_v19 = vpop.f32.mrf.mxu1 }
 0x273   : > { %v1743_v54 = vadd.f32 %v2152_v11, %v1742_v19 }
 0x275   : > { %v1761_v8 = vadd.f32 %v1760_v37, %v1743_v54 }
 0x277   : > { %v1762_v29 = vpop.f32.mrf.mxu2  ;;  %v1769_v61 = vmax.f32 %v1761_v8, 0.0 }
 0x27a   : > { %v1744_v46 = vpop.f32.mrf.mxu1 }
 0x27b   : > { %v1745_v34 = vadd.f32 %v2152_v11, %v1744_v46 }
 0x27d   : > { %v1763_v31 = vadd.f32 %v1762_v29, %v1745_v34 }
 0x27f   : > { %v1770_v4 = vmax.f32 %v1763_v31, 0.0 }
 0x281   : > { %v1772_v53 = vpack.c.bf16 %v1770_v4, %v1769_v61 }
 0x283   : > { %2054 = vmatmul.msk.bf16.vlgmr.msrb.gmra.mxu3 %vm554_vm3, %v1772_v53 }
 0x28b   : > { %v1747_v3 = vpop.f32.mrf.mxu1 }
 0x28c   : > { %v1748_v20 = vadd.f32 %v2152_v11, %v1747_v3 }
 0x291   : > { %v1765_v21 = vpop.f32.mrf.mxu2 }
 0x292   : > { %v1766_v43 = vadd.f32 %v1765_v21, %v1748_v20 }
 0x293   : > { %v1749_v57 = vpop.f32.mrf.mxu1 }
 0x294   : > { %v1771_v16 = vmax.f32 %v1766_v43, 0.0 }
 0x296   : > { %v1773_v60 = vpack.c.bf16 %v1771_v16, %v1771_v16 }
 0x298   : > { %2055 = vmatmul.msk.bf16.gmra.mxu3 %vm554_vm3, %v1773_v60 }
 0x299   : > { %v1767_v32 = vpop.f32.mrf.mxu2 }
 0x306   : > { %v1801_v2 = vpop.f32.mrf.mxu3 }
 0x307   : > { %v1802_v28 = vadd.f32 %v2153_v17, %v1801_v2 }
 0x309   : > { %1810 = vst [vmem:[%s271_s19] sm:$0xff] %v1802_v28 }
 0x30e   : > { %v1803_v13 = vpop.f32.mrf.mxu3 }
 0x30f   : > { %v1804_v18 = vadd.f32 %v2153_v17, %v1803_v13 }
 0x311   : > { %1811 = vst [vmem:[%s271_s19 + $0x8] sm:$0xff] %v1804_v18 }
 0x31b   : > { %v1806_v39 = vpop.f32.mrf.mxu3 }
 0x31c   : > { %v1807_v22 = vadd.f32 %v2153_v17, %v1806_v39 }
 0x31e   : > { %1812 = vst [vmem:[%s271_s19 + $0x10] sm:$0xff] %v1807_v22 }
 0x31f   : > { %2181 = shalt.err (!%p2178_p3)
}
 0x320   : > { %s2227_s23 = smov 128   ;;  %s2228_s19 = smov 8  }
 0x321   : > { %2101 = dma.vmem_to_hbm [thread:$0]  (%p2307_p5), %s1827_s8, 384, %s1829_s9, %s1814_s13, %s2227_s23, %s2227_s23, %s2228_s19  }
 0x323   : > { %v1808_v41 = vpop.f32.mrf.mxu3 }
 0x324 PF: > { %p2107_p4 = scmp.ge.s32.totalorder %s2216_s27, 2  ;;  %s1843_s21 = sand.u32 1, %s2204_s24  }
 0x325   : > { %s1844_s22 = scalar_lea.sflag [#allocation6], %s1843_s21 }
 0x326   : > { %p2104_p7 = pnand %p2107_p4, %p2311_p6 }
 0x328   : > { %p2105_p8 = pneg %p2104_p7 }
 0x32a   : > { %2199 = dma.done.wait (%p2105_p8), %s1844_s22, 384  }
 0x32b   : > { %2201 = vsyncadd (%p2105_p8), %s1844_s22, 4294966912  ;;  %p17_p9 = scmp.ge.s32.totalorder %s2294_s30, 4   ;;  %s3081_s24 = smov %s2208_s25 }
 0x32c   : > { %s3082_s25 = smov %s2212_s26  ;;  %s3083_s26 = smov %s2305_s10 }
 0x32d   : > { %s3084_s27 = smov %s2294_s30  ;;  %19 = sbr.rel (!%p17_p9) target bundleno = 3 (0x3), region = 83 }
 0x332   :  { %1850 = vsyncpa [#allocation6], 1 }
 0x333   :  { %1852 = vsyncpa [#allocation6 + $0x1], 1 }

</bundles_post_ra>
